<compile_context>
chip_gen: v6e
topology: v6e:2x2x1
jax: 0.10.0
libtpu: 0.0.40
codegen_flags: <defaults>
</compile_context>

<pallas_src>
import math

import jax
import jax.numpy as jnp
from jax.experimental import pallas as pl
from jax.experimental.pallas import tpu as pltpu

H_DIM = 400          # true hidden width (PyTorch model)
H_PAD = 512          # lane-dense padded hidden width (multiple of 128)
IN_DIM = 2
OUT_DIM = 2
OUT_PAD = 128        # lane-dense padded output width


def _mlp_kernel(z_ref,
                w1_ref, b1_ref,
                w2_ref, b2_ref,
                w3_ref, b3_ref,
                w4_ref, b4_ref,
                o_ref):
    z = z_ref[...]                                   # (TB, 2) f32

    # Layer 1 on the VPU: K=2 would waste an entire MXU pass, so do it as two
    # broadcast FMAs in otherwise-idle VALU slots (f32 -- safe on v5e too).
    h = (z[:, 0:1] * w1_ref[0:1, :]
         + z[:, 1:2] * w1_ref[1:2, :]
         + b1_ref[...])                              # (TB, 512) f32
    h = jnp.maximum(h, 0.0)

    # Layer 2: (TB,512) @ (512,512) on the MXU, bf16 inputs, f32 accumulate.
    h = jnp.dot(h.astype(jnp.bfloat16), w2_ref[...],
                preferred_element_type=jnp.float32)
    h = jnp.maximum(h + b2_ref[...], 0.0)            # f32 bias + ReLU

    # Layer 3: same shape as layer 2.
    h = jnp.dot(h.astype(jnp.bfloat16), w3_ref[...],
                preferred_element_type=jnp.float32)
    h = jnp.maximum(h + b3_ref[...], 0.0)

    # Layer 4 (no activation): (TB,512) @ (512,128) -> lane-dense store.
    out = jnp.dot(h.astype(jnp.bfloat16), w4_ref[...],
                  preferred_element_type=jnp.float32)
    o_ref[...] = (out + b4_ref[...]).astype(o_ref.dtype)


def _pad_params(params):
    """Zero-pad hidden 400 -> 512 and output 2 -> 128; cast MXU weights to bf16.

    Padded hidden units get zero incoming weights and zero bias, so after
    ReLU they are exactly zero; padded rows of the next layer's weight are
    zero, so they contribute nothing.  Padded output columns are zero and are
    sliced off on the host.  Only the bf16 cast changes numerics (~1e-3)."""
    (w1, b1), (w2, b2), (w3, b3), (w4, b4) = params
    dh = H_PAD - H_DIM
    do = OUT_PAD - OUT_DIM
    w1p = jnp.pad(w1, ((0, 0), (0, dh)))                         # (2, 512) f32
    b1p = jnp.pad(b1, ((0, 0), (0, dh)))                         # (1, 512) f32
    w2p = jnp.pad(w2, ((0, dh), (0, dh))).astype(jnp.bfloat16)   # (512, 512) bf16
    b2p = jnp.pad(b2, ((0, 0), (0, dh)))                         # (1, 512) f32
    w3p = jnp.pad(w3, ((0, dh), (0, dh))).astype(jnp.bfloat16)   # (512, 512) bf16
    b3p = jnp.pad(b3, ((0, 0), (0, dh)))                         # (1, 512) f32
    w4p = jnp.pad(w4, ((0, dh), (0, do))).astype(jnp.bfloat16)   # (512, 128) bf16
    b4p = jnp.pad(b4, ((0, 0), (0, do)))                         # (1, 128) f32
    return (w1p, b1p), (w2p, b2p), (w3p, b3p), (w4p, b4p)


def _choose_tile(batch, batch_tile):
    """Batch tile: multiple of 8; >=2 grid steps whenever B >= 16 (v7x has 2
    TensorCores); right-sized so padded rows are minimized."""
    b8 = ((batch + 7) // 8) * 8
    if batch < 16:
        return b8                                  # single small tile
    num_tiles = max(2, -(-b8 // batch_tile))       # ceil, at least 2
    tb = -(-batch // num_tiles)                    # ceil(B / num_tiles)
    return ((tb + 7) // 8) * 8


def g_forward(z, params, *, batch_tile=512):
    """Forward pass of G. z: [B, 2] float32 -> [B, 2] float32."""
    (w1, b1), (w2, b2), (w3, b3), (w4, b4) = _pad_params(params)
    B = z.shape[0]

    tb = _choose_tile(B, batch_tile)
    b_pad = ((B + tb - 1) // tb) * tb
    z_pad = jnp.pad(z, ((0, b_pad - B), (0, 0))) if b_pad != B else z

    grid = (b_pad // tb,)

    # Weights/biases: full-array blocks, constant index map -> resident in
    # VMEM across all grid steps (DMA'd once).
    def resident(shape):
        return pl.BlockSpec(shape, lambda i, _n=len(shape): (0,) * _n)

    # Advisory cost for the XLA scheduler.
    flops = 2 * b_pad * (IN_DIM * H_PAD + 2 * H_PAD * H_PAD + H_PAD * OUT_PAD)
    weight_bytes = (w1.size * 4 + b1.size * 4 + w2.size * 2 + b2.size * 4 +
                    w3.size * 2 + b3.size * 4 + w4.size * 2 + b4.size * 4)
    bytes_accessed = weight_bytes + b_pad * IN_DIM * 4 + b_pad * OUT_PAD * 4
    cost = pl.CostEstimate(flops=int(flops), transcendentals=0,
                           bytes_accessed=int(bytes_accessed))

    out = pl.pallas_call(
        _mlp_kernel,
        out_shape=jax.ShapeDtypeStruct((b_pad, OUT_PAD), jnp.float32),
        grid=grid,
        in_specs=[
            pl.BlockSpec((tb, IN_DIM), lambda i: (i, 0)),
            resident(w1.shape), resident(b1.shape),
            resident(w2.shape), resident(b2.shape),
            resident(w3.shape), resident(b3.shape),
            resident(w4.shape), resident(b4.shape),
        ],
        out_specs=pl.BlockSpec((tb, OUT_PAD), lambda i: (i, 0)),
        compiler_params=pltpu.CompilerParams(
            dimension_semantics=("parallel",),
            vmem_limit_bytes=32 << 20,
        ),
        cost_estimate=cost,
    )(z_pad, w1, b1, w2, b2, w3, b3, w4, b4)

    return out[:B, :OUT_DIM]


def init_params(key):
    """Deterministic init mimicking PyTorch nn.Linear default:
    U(-1/sqrt(fan_in), 1/sqrt(fan_in)) for both weight and bias.
    Weights stored as [in, out] (transposed relative to PyTorch)."""
    dims = [(IN_DIM, H_DIM), (H_DIM, H_DIM), (H_DIM, H_DIM), (H_DIM, OUT_DIM)]
    params = []
    for (fan_in, fan_out) in dims:
        key, kw, kb = jax.random.split(key, 3)
        bound = 1.0 / math.sqrt(fan_in)
        w = jax.random.uniform(kw, (fan_in, fan_out), jnp.float32,
                               minval=-bound, maxval=bound)
        b = jax.random.uniform(kb, (1, fan_out), jnp.float32,
                               minval=-bound, maxval=bound)
        params.append((w, b))
    return params


def g_reference(z, params):
    """Plain-JAX f32 reference for correctness checking (unpadded)."""
    (w1, b1), (w2, b2), (w3, b3), (w4, b4) = params
    h = jnp.maximum(z @ w1 + b1, 0.0)
    h = jnp.maximum(h @ w2 + b2, 0.0)
    h = jnp.maximum(h @ w3 + b3, 0.0)
    return h @ w4 + b4


if __name__ == "__main__":
    key = jax.random.PRNGKey(0)
    key, kz = jax.random.split(key)

    batch = 8
    z = jax.random.normal(kz, (batch, IN_DIM), jnp.float32)
    params = init_params(key)

    out = jax.block_until_ready(g_forward(z, params))
    ref = jax.block_until_ready(g_reference(z, params))

    assert out.shape == (batch, OUT_DIM), out.shape
    assert out.dtype == jnp.float32, out.dtype
    # bf16 matmul inputs (f32 accumulate) => loosened tolerance vs f32 ref.
    assert jnp.allclose(out, ref, atol=2e-2, rtol=2e-2), (
        "mismatch vs reference: max abs err = %e"
        % float(jnp.max(jnp.abs(out - ref))))

    # Batch that is not a multiple of 8 and exercises the >=2-tile grid path.
    z2 = jax.random.normal(jax.random.PRNGKey(1), (300, IN_DIM), jnp.float32)
    out2 = jax.block_until_ready(g_forward(z2, params))
    ref2 = g_reference(z2, params)
    assert out2.shape == (300, OUT_DIM)
    assert jnp.allclose(out2, ref2, atol=2e-2, rtol=2e-2)

    # Typical GAN batch size: grid >= 2 so both v7x TensorCores are used.
    z3 = jax.random.normal(jax.random.PRNGKey(2), (64, IN_DIM), jnp.float32)
    out3 = jax.block_until_ready(g_forward(z3, params))
    ref3 = g_reference(z3, params)
    assert out3.shape == (64, OUT_DIM)
    assert jnp.allclose(out3, ref3, atol=2e-2, rtol=2e-2)

    print("KERNEL_OK")
</pallas_src>

<mosaic_0001>
module attributes {stable_mosaic.version = 11 : i64} {
  func.func @_mlp_kernel(%arg0: i32, %arg1: memref<8x2xf32, #tpu.memory_space<vmem>>, %arg2: memref<2x512xf32, #tpu.memory_space<vmem>>, %arg3: memref<1x512xf32, #tpu.memory_space<vmem>>, %arg4: memref<512x512xbf16, #tpu.memory_space<vmem>>, %arg5: memref<1x512xf32, #tpu.memory_space<vmem>>, %arg6: memref<512x512xbf16, #tpu.memory_space<vmem>>, %arg7: memref<1x512xf32, #tpu.memory_space<vmem>>, %arg8: memref<512x128xbf16, #tpu.memory_space<vmem>>, %arg9: memref<1x128xf32, #tpu.memory_space<vmem>>, %arg10: memref<8x128xf32, #tpu.memory_space<vmem>>) attributes {dimension_semantics = [#tpu.dimension_semantics<parallel>], iteration_bounds = array<i64: 1>, scalar_prefetch = 0 : i64, scratch_operands = 0 : i64, tpu.core_type = #tpu.core_type<tc>, window_params = [{transform_indices = @transform_0, window_bounds = array<i64: 8, 2>}, {pipeline_mode = #tpu.pipeline_mode<synchronous>, transform_indices = @transform_1, window_bounds = array<i64: 2, 512>}, {pipeline_mode = #tpu.pipeline_mode<synchronous>, transform_indices = @transform_2, window_bounds = array<i64: 1, 512>}, {pipeline_mode = #tpu.pipeline_mode<synchronous>, transform_indices = @transform_3, window_bounds = array<i64: 512, 512>}, {pipeline_mode = #tpu.pipeline_mode<synchronous>, transform_indices = @transform_4, window_bounds = array<i64: 1, 512>}, {pipeline_mode = #tpu.pipeline_mode<synchronous>, transform_indices = @transform_5, window_bounds = array<i64: 512, 512>}, {pipeline_mode = #tpu.pipeline_mode<synchronous>, transform_indices = @transform_6, window_bounds = array<i64: 1, 512>}, {pipeline_mode = #tpu.pipeline_mode<synchronous>, transform_indices = @transform_7, window_bounds = array<i64: 512, 128>}, {pipeline_mode = #tpu.pipeline_mode<synchronous>, transform_indices = @transform_8, window_bounds = array<i64: 1, 128>}, {transform_indices = @transform_9, window_bounds = array<i64: 8, 128>}]} {
    %c0 = arith.constant 0 : index
    %c0_0 = arith.constant 0 : index
    %0 = vector.load %arg1[%c0, %c0_0] : memref<8x2xf32, #tpu.memory_space<vmem>>, vector<8x2xf32>
    %1 = vector.extract_strided_slice %0 {offsets = [0, 0], sizes = [8, 1], strides = [1, 1]} : vector<8x2xf32> to vector<8x1xf32>
    %c0_1 = arith.constant 0 : index
    %c0_2 = arith.constant 0 : index
    %2 = vector.load %arg2[%c0_1, %c0_2] : memref<2x512xf32, #tpu.memory_space<vmem>>, vector<1x512xf32>
    %3 = vector.broadcast %1 : vector<8x1xf32> to vector<8x512xf32>
    %4 = vector.broadcast %2 : vector<1x512xf32> to vector<8x512xf32>
    %5 = arith.mulf %3, %4 : vector<8x512xf32>
    %6 = vector.extract_strided_slice %0 {offsets = [0, 1], sizes = [8, 1], strides = [1, 1]} : vector<8x2xf32> to vector<8x1xf32>
    %c1 = arith.constant 1 : index
    %c0_3 = arith.constant 0 : index
    %7 = vector.load %arg2[%c1, %c0_3] : memref<2x512xf32, #tpu.memory_space<vmem>>, vector<1x512xf32>
    %8 = vector.broadcast %6 : vector<8x1xf32> to vector<8x512xf32>
    %9 = vector.broadcast %7 : vector<1x512xf32> to vector<8x512xf32>
    %10 = arith.mulf %8, %9 : vector<8x512xf32>
    %11 = arith.addf %5, %10 : vector<8x512xf32>
    %c0_4 = arith.constant 0 : index
    %c0_5 = arith.constant 0 : index
    %12 = vector.load %arg3[%c0_4, %c0_5] : memref<1x512xf32, #tpu.memory_space<vmem>>, vector<1x512xf32>
    %13 = vector.broadcast %12 : vector<1x512xf32> to vector<8x512xf32>
    %14 = arith.addf %11, %13 : vector<8x512xf32>
    %cst = arith.constant 0.000000e+00 : f32
    %15 = vector.broadcast %cst : f32 to vector<8x512xf32>
    %16 = arith.maximumf %14, %15 : vector<8x512xf32>
    %17 = arith.truncf %16 : vector<8x512xf32> to vector<8x512xbf16>
    %c0_6 = arith.constant 0 : index
    %c0_7 = arith.constant 0 : index
    %18 = vector.load %arg4[%c0_6, %c0_7] : memref<512x512xbf16, #tpu.memory_space<vmem>>, vector<512x512xbf16>
    %cst_8 = arith.constant dense<0.000000e+00> : vector<8x512xf32>
    %19 = tpu.matmul %17, %18, %cst_8 {dimension_numbers = #tpu.dot_dimension_numbers<[1], [0], [0], [1], [0, 0, 1, 1], [], []>} : vector<8x512xbf16>, vector<512x512xbf16>, vector<8x512xf32> -> vector<8x512xf32>
    %c0_9 = arith.constant 0 : index
    %c0_10 = arith.constant 0 : index
    %20 = vector.load %arg5[%c0_9, %c0_10] : memref<1x512xf32, #tpu.memory_space<vmem>>, vector<1x512xf32>
    %21 = vector.broadcast %20 : vector<1x512xf32> to vector<8x512xf32>
    %22 = arith.addf %19, %21 : vector<8x512xf32>
    %cst_11 = arith.constant 0.000000e+00 : f32
    %23 = vector.broadcast %cst_11 : f32 to vector<8x512xf32>
    %24 = arith.maximumf %22, %23 : vector<8x512xf32>
    %25 = arith.truncf %24 : vector<8x512xf32> to vector<8x512xbf16>
    %c0_12 = arith.constant 0 : index
    %c0_13 = arith.constant 0 : index
    %26 = vector.load %arg6[%c0_12, %c0_13] : memref<512x512xbf16, #tpu.memory_space<vmem>>, vector<512x512xbf16>
    %cst_14 = arith.constant dense<0.000000e+00> : vector<8x512xf32>
    %27 = tpu.matmul %25, %26, %cst_14 {dimension_numbers = #tpu.dot_dimension_numbers<[1], [0], [0], [1], [0, 0, 1, 1], [], []>} : vector<8x512xbf16>, vector<512x512xbf16>, vector<8x512xf32> -> vector<8x512xf32>
    %c0_15 = arith.constant 0 : index
    %c0_16 = arith.constant 0 : index
    %28 = vector.load %arg7[%c0_15, %c0_16] : memref<1x512xf32, #tpu.memory_space<vmem>>, vector<1x512xf32>
    %29 = vector.broadcast %28 : vector<1x512xf32> to vector<8x512xf32>
    %30 = arith.addf %27, %29 : vector<8x512xf32>
    %cst_17 = arith.constant 0.000000e+00 : f32
    %31 = vector.broadcast %cst_17 : f32 to vector<8x512xf32>
    %32 = arith.maximumf %30, %31 : vector<8x512xf32>
    %33 = arith.truncf %32 : vector<8x512xf32> to vector<8x512xbf16>
    %c0_18 = arith.constant 0 : index
    %c0_19 = arith.constant 0 : index
    %34 = vector.load %arg8[%c0_18, %c0_19] : memref<512x128xbf16, #tpu.memory_space<vmem>>, vector<512x128xbf16>
    %cst_20 = arith.constant dense<0.000000e+00> : vector<8x128xf32>
    %35 = tpu.matmul %33, %34, %cst_20 {dimension_numbers = #tpu.dot_dimension_numbers<[1], [0], [0], [1], [0, 0, 1, 1], [], []>} : vector<8x512xbf16>, vector<512x128xbf16>, vector<8x128xf32> -> vector<8x128xf32>
    %c0_21 = arith.constant 0 : index
    %c0_22 = arith.constant 0 : index
    %36 = vector.load %arg9[%c0_21, %c0_22] : memref<1x128xf32, #tpu.memory_space<vmem>>, vector<1x128xf32>
    %37 = vector.broadcast %36 : vector<1x128xf32> to vector<8x128xf32>
    %38 = arith.addf %35, %37 : vector<8x128xf32>
    %c0_23 = arith.constant 0 : index
    %c0_24 = arith.constant 0 : index
    %39 = vector.load %arg10[%c0_23, %c0_24] : memref<8x128xf32, #tpu.memory_space<vmem>>, vector<8x128xf32>
    tpu.vector_store %arg10[%c0_23, %c0_24], %38 {strides = array<i32>} : memref<8x128xf32, #tpu.memory_space<vmem>>, vector<8x128xf32>,
    return
  }
  func.func @transform_0(%arg0: i32) -> (i32, i32) {
    %c0_i32 = arith.constant 0 : i32
    %c0_i32_0 = arith.constant 0 : i32
    return %arg0, %c0_i32 : i32, i32
  }
  func.func @transform_1(%arg0: i32) -> (i32, i32) {
    %c0_i32 = arith.constant 0 : i32
    %c0_i32_0 = arith.constant 0 : i32
    %c0_i32_1 = arith.constant 0 : i32
    return %c0_i32, %c0_i32_0 : i32, i32
  }
  func.func @transform_2(%arg0: i32) -> (i32, i32) {
    %c0_i32 = arith.constant 0 : i32
    %c0_i32_0 = arith.constant 0 : i32
    %c0_i32_1 = arith.constant 0 : i32
    return %c0_i32, %c0_i32_0 : i32, i32
  }
  func.func @transform_3(%arg0: i32) -> (i32, i32) {
    %c0_i32 = arith.constant 0 : i32
    %c0_i32_0 = arith.constant 0 : i32
    %c0_i32_1 = arith.constant 0 : i32
    return %c0_i32, %c0_i32_0 : i32, i32
  }
  func.func @transform_4(%arg0: i32) -> (i32, i32) {
    %c0_i32 = arith.constant 0 : i32
    %c0_i32_0 = arith.constant 0 : i32
    %c0_i32_1 = arith.constant 0 : i32
    return %c0_i32, %c0_i32_0 : i32, i32
  }
  func.func @transform_5(%arg0: i32) -> (i32, i32) {
    %c0_i32 = arith.constant 0 : i32
    %c0_i32_0 = arith.constant 0 : i32
    %c0_i32_1 = arith.constant 0 : i32
    return %c0_i32, %c0_i32_0 : i32, i32
  }
  func.func @transform_6(%arg0: i32) -> (i32, i32) {
    %c0_i32 = arith.constant 0 : i32
    %c0_i32_0 = arith.constant 0 : i32
    %c0_i32_1 = arith.constant 0 : i32
    return %c0_i32, %c0_i32_0 : i32, i32
  }
  func.func @transform_7(%arg0: i32) -> (i32, i32) {
    %c0_i32 = arith.constant 0 : i32
    %c0_i32_0 = arith.constant 0 : i32
    %c0_i32_1 = arith.constant 0 : i32
    return %c0_i32, %c0_i32_0 : i32, i32
  }
  func.func @transform_8(%arg0: i32) -> (i32, i32) {
    %c0_i32 = arith.constant 0 : i32
    %c0_i32_0 = arith.constant 0 : i32
    %c0_i32_1 = arith.constant 0 : i32
    return %c0_i32, %c0_i32_0 : i32, i32
  }
  func.func @transform_9(%arg0: i32) -> (i32, i32) {
    %c0_i32 = arith.constant 0 : i32
    %c0_i32_0 = arith.constant 0 : i32
    return %arg0, %c0_i32 : i32, i32
  }
}

</mosaic_0001>

<bundles_post_ra>
// kernel: tpu_custom_call.1
= control target key start
LH: loop header
LB: loop body
LE: loop exit
PB: predicated region body
PF: predicated region fallthrough
CT: control target
= control target key end

     0   :  { %14 = vsyncpa [#allocation3], 0  ;;  %s3451_s0 = inlined_call_operand.vmem [shape: f32[8,2], index: 0, kind: input, shape index: {}]   ;;  %s3452_s1 = inlined_call_operand.vmem [shape: f32[2,512], index: 1, kind: input, shape index: {}]   ;;  %s3453_s2 = inlined_call_operand.vmem [shape: f32[1,512], index: 2, kind: input, shape index: {}]   ;;  %s3454_s3 = inlined_call_operand.hbm [shape: bf16[512,512], index: 3, kind: input, shape index: {}]   ;;  %s3455_s4 = inlined_call_operand.vmem [shape: f32[1,512], index: 4, kind: input, shape index: {}]   ;;  %s3456_s5 = inlined_call_operand.hbm [shape: bf16[512,512], index: 5, kind: input, shape index: {}]   ;;  %s3457_s6 = inlined_call_operand.vmem [shape: f32[1,512], index: 6, kind: input, shape index: {}]   ;;  %s3458_s7 = inlined_call_operand.hbm [shape: bf16[512,128], index: 7, kind: input, shape index: {}]   ;;  %s3459_s8 = inlined_call_operand.vmem [shape: f32[1,128], index: 8, kind: input, shape index: {}]   ;;  %s3460_s9 = inlined_call_operand.hbm [shape: f32[8,128], index: 9, kind: output, shape index: {}]  }
   0x1   :  { %15 = vsyncpa [#allocation6], 0 }
   0x2   :  { %16 = vsyncpa [#allocation4], 0  ;;  %s3308_s30 = smov [#allocation5]   ;;  %s3309_s11 = smov [#allocation2]  }
   0x3   :  { %s42_s10 = sshll.u32 %s3308_s30, 4  ;;  %s28_s12 = sshll.u32 %s3309_s11, 4  ;;  %s43_s10 = int_to_ptr.vmem [resolvable:$true] %s42_s10  ;;  %s29_s12 = int_to_ptr.vmem [resolvable:$true] %s28_s12 }
   0x4   :  { %s3230_s13 = scalar_lea.vmem %s43_s10, 16384  ;;  %p3235_p1 = scmp.lt.s32.totalorder %s43_s10, %s43_s10 }
   0x5   :  { %p3231_p0 = scmp.ne.s32.totalorder %s43_s10, %s3230_s13  ;;  %p3236_p2 = scmp.lt.s32.totalorder %s3230_s13, %s3230_s13 }
   0x7   :  { %p3237_p3 = por %p3236_p2, %p3235_p1 }
   0x9   :  { %p3238_p4 = pnand %p3237_p3, %p3231_p0 }
   0xb   :  { %3241 = shalt.err (!%p3238_p4)
}
   0xc   :  { %s3310_s14 = smov 256   ;;  %s3311_s15 = smov 16  }
   0xd   :  { %48 = dma.hbm_to_vmem [thread:$0]  %s3456_s5, 16384, %s43_s10, [#allocation6], %s3310_s14, %s3310_s14, %s3311_s15  }
   0xe   :  { %s3250_s18 = scalar_lea.vmem %s29_s12, 16384  ;;  %p3255_p6 = scmp.lt.s32.totalorder %s29_s12, %s29_s12 }
   0xf   :  { %p3251_p5 = scmp.ne.s32.totalorder %s29_s12, %s3250_s18  ;;  %p3256_p7 = scmp.lt.s32.totalorder %s3250_s18, %s3250_s18 }
  0x11   :  { %p3257_p8 = por %p3256_p7, %p3255_p6 }
  0x13   :  { %p3258_p9 = pnand %p3257_p8, %p3251_p5 }
  0x15   :  { %3261 = shalt.err (!%p3258_p9)
}
  0x16   :  { %34 = dma.hbm_to_vmem [thread:$0]  %s3454_s3, 16384, %s29_s12, [#allocation3], %s3310_s14, %s3310_s14, %s3311_s15  }
  0x17   :  { %s3312_s21 = smov [#allocation7]  }
  0x18   :  { %s56_s22 = sshll.u32 %s3312_s21, 4  ;;  %s57_s22 = int_to_ptr.vmem [resolvable:$true] %s56_s22 }
  0x19   :  { %s3270_s23 = scalar_lea.vmem %s57_s22, 4096  ;;  %p3275_p11 = scmp.lt.s32.totalorder %s57_s22, %s57_s22 }
  0x1a   :  { %p3271_p10 = scmp.ne.s32.totalorder %s57_s22, %s3270_s23  ;;  %p3276_p12 = scmp.lt.s32.totalorder %s3270_s23, %s3270_s23 }
  0x1c   :  { %p3277_p13 = por %p3276_p12, %p3275_p11 }
  0x1e   :  { %p3278_p0 = pnand %p3277_p13, %p3271_p10 }
  0x20   :  { %3281 = shalt.err (!%p3278_p0)
}
  0x21   :  { %s3313_s5 = smov 64   ;;  %s3314_s24 = smov 4  }
  0x22   :  { %62 = dma.hbm_to_vmem [thread:$0]  %s3458_s7, 4096, %s57_s22, [#allocation6], %s3313_s5, %s3313_s5, %s3314_s24  }
  0x23   :  { %3302 = dma.done.wait [#allocation3], 16384  }
  0x24   :  { %3303 = vsyncadd [#allocation3], 4294950912 }
  0x25   :  { %3304 = dma.done.wait [#allocation6], 20480  }
  0x26   :  { %3305 = vsyncadd [#allocation6], 4294946816  ;;  %v3315_v0 = vmov 0   ;;  %v75_v1 = vld [vmem:[%s3451_s0] sm:$0xff]  ;;  %v2806_v2 = vld [vmem:[#allocation2 + $0xe4] ss:$16 sps:$4 sm:$0xff]  }
  0x27   :  { %2804 = vset.pattern.permute.xlu0 %v3315_v0  ;;  %v2808_v3 = vld [vmem:[#allocation2 + $0x2e4] ss:$16 sps:$4 sm:$0xff]   ;;  %v2810_v4 = vld [vmem:[#allocation2 + $0xe0] ss:$16 sps:$4 sm:$0xff]   ;;  %966 = vmatprep.subr.bf16.mxu0 %v2806_v2  ;;  %v3316_v8 = vmov 1   ;;  %s3317_s13 = smov [#allocation8]  }
  0x28   :  { %79 = vperm.xlu0 %2804, %v75_v1   ;;  %v2811_v5 = vld [vmem:[#allocation2 + $0x2e0] ss:$16 sps:$4 sm:$0xff]   ;;  %v2812_v6 = vld [vmem:[#allocation2 + $0xc4] ss:$16 sps:$4 sm:$0xff]   ;;  %1007 = vmatprep.subr.bf16.mxu1 %v2808_v3  ;;  %v2904_v3 = vld [vmem:[#allocation2 + $0xec] ss:$16 sps:$4 sm:$0xff]  }
  0x29   :  { %967 = vmatpush1.bf16.msra.mxu0 %v2810_v4  ;;  %v2814_v7 = vld [vmem:[#allocation2 + $0x2c4] ss:$16 sps:$4 sm:$0xff]   ;;  %1008 = vmatpush1.bf16.msra.mxu1 %v2811_v5  ;;  %v2816_v9 = vld [vmem:[#allocation2 + $0xc0] ss:$16 sps:$4 sm:$0xff]   ;;  %v2907_v4 = vld [vmem:[#allocation2 + $0x2ec] ss:$16 sps:$4 sm:$0xff]   ;;  %v83_v5 = vlaneseq }
  0x2a   :  { %v2817_v10 = vld [vmem:[#allocation2 + $0x2c0] ss:$16 sps:$4 sm:$0xff]   ;;  %968 = vmatprep.subr.bf16.mxu0 %v2812_v6  ;;  %v2818_v11 = vld [vmem:[#allocation2 + $0xa4] ss:$16 sps:$4 sm:$0xff]   ;;  %1009 = vmatprep.subr.bf16.mxu1 %v2814_v7  ;;  %s2450_s14 = sshll.u32 %s3317_s13, 4  ;;  %s2451_s14 = int_to_ptr.vmem [resolvable:$true] %s2450_s14 }
  0x2b   :  { %v2820_v12 = vld [vmem:[#allocation2 + $0x2a4] ss:$16 sps:$4 sm:$0xff]   ;;  %v2822_v13 = vld [vmem:[#allocation2 + $0xa0] ss:$16 sps:$4 sm:$0xff]   ;;  %v84_v6 = vshrl.u32 %v83_v5, 7  ;;  %s3282_s15 = scalar_lea.vmem %s2451_s14, 128  ;;  %p3287_p2 = scmp.lt.s32.totalorder %s2451_s14, %s2451_s14 }
  0x2c   :  { %2805 = vset.pattern.permute.xlu0 %v3316_v8  ;;  %v2823_v14 = vld [vmem:[#allocation2 + $0x2a0] ss:$16 sps:$4 sm:$0xff]   ;;  %v2824_v15 = vld [vmem:[#allocation2 + $0x84] ss:$16 sps:$4 sm:$0xff]   ;;  %v2929_v5 = vld [vmem:[#allocation2 + $0x268] ss:$16 sps:$4 sm:$0xff]   ;;  %p3283_p1 = scmp.ne.s32.totalorder %s2451_s14, %s3282_s15  ;;  %p3288_p3 = scmp.lt.s32.totalorder %s3282_s15, %s3282_s15 }
  0x2d   :  { %110 = vperm.xlu0 %2805, %v75_v1   ;;  %969 = vmatpush1.bf16.msra.mxu0 %v2816_v9  ;;  %v2826_v16 = vld [vmem:[#allocation2 + $0x284] ss:$16 sps:$4 sm:$0xff]   ;;  %v2828_v17 = vld [vmem:[#allocation2 + $0x80] ss:$16 sps:$4 sm:$0xff]   ;;  %v3383_v8 = vsub.s32 0, %v84_v6  ;;  %v3385_v9 = vsub.s32 1, %v84_v6 }
  0x2e   :  { %1010 = vmatpush1.bf16.msra.mxu1 %v2817_v10  ;;  %970 = vmatprep.subr.bf16.mxu0 %v2818_v11  ;;  %v2829_v18 = vld [vmem:[#allocation2 + $0x280] ss:$16 sps:$4 sm:$0xff]   ;;  %v2830_v19 = vld [vmem:[#allocation2 + $0x64] ss:$16 sps:$4 sm:$0xff]   ;;  %v3387_v10 = vsub.s32 2, %v84_v6  ;;  %v3389_v11 = vsub.s32 3, %v84_v6  ;;  %p3289_p4 = por %p3288_p3, %p3287_p2 }
  0x2f   :  { %1011 = vmatprep.subr.bf16.mxu1 %v2820_v12  ;;  %v2832_v20 = vld [vmem:[#allocation2 + $0x264] ss:$16 sps:$4 sm:$0xff]   ;;  %v2834_v21 = vld [vmem:[#allocation2 + $0x60] ss:$16 sps:$4 sm:$0xff]   ;;  %v2934_v6 = vld [vmem:[#allocation2 + $0x4c] ss:$16 sps:$4 sm:$0xff]  }
  0x30   :  { %v2835_v22 = vld [vmem:[#allocation2 + $0x260] ss:$16 sps:$4 sm:$0xff]   ;;  %v2836_v23 = vld [vmem:[#allocation2 + $0x44] ss:$16 sps:$4 sm:$0xff]   ;;  %p3290_p5 = pnand %p3289_p4, %p3283_p1 }
  0x31   :  { %971 = vmatpush1.bf16.msra.mxu0 %v2822_v13  ;;  %v2838_v24 = vld [vmem:[#allocation2 + $0x244] ss:$16 sps:$4 sm:$0xff]   ;;  %v2840_v25 = vld [vmem:[#allocation2 + $0x40] ss:$16 sps:$4 sm:$0xff]   ;;  %v142_v13 = vld [vmem:[%s3453_s2] sm:$0xf] }
  0x32   :  { %1012 = vmatpush1.bf16.msra.mxu1 %v2823_v14  ;;  %972 = vmatprep.subr.bf16.mxu0 %v2824_v15  ;;  %v2841_v26 = vld [vmem:[#allocation2 + $0x240] ss:$16 sps:$4 sm:$0xff]   ;;  %v2842_v27 = vld [vmem:[#allocation2 + $0x24] ss:$16 sps:$4 sm:$0xff]  }
  0x33   :  { %1013 = vmatprep.subr.bf16.mxu1 %v2826_v16  ;;  %v2844_v28 = vld [vmem:[#allocation2 + $0x224] ss:$16 sps:$4 sm:$0xff]   ;;  %v2846_v29 = vld [vmem:[#allocation2 + $0x20] ss:$16 sps:$4 sm:$0xff]  }
  0x34   :  { %v2847_v30 = vld [vmem:[#allocation2 + $0x220] ss:$16 sps:$4 sm:$0xff]   ;;  %v2848_v31 = vld [vmem:[#allocation2 + $0x4] ss:$16 sps:$4 sm:$0xff]  }
  0x35   :  { %973 = vmatpush1.bf16.msra.mxu0 %v2828_v17  ;;  %v2850_v32 = vld [vmem:[#allocation2 + $0x204] ss:$16 sps:$4 sm:$0xff]   ;;  %v2852_v33 = vld [vmem:[#allocation2] ss:$16 sps:$4 sm:$0xff]  }
  0x36   :  { %1014 = vmatpush1.bf16.msra.mxu1 %v2829_v18  ;;  %974 = vmatprep.subr.bf16.mxu0 %v2830_v19  ;;  %v2853_v34 = vld [vmem:[#allocation2 + $0x200] ss:$16 sps:$4 sm:$0xff]   ;;  %v2854_v35 = vld [vmem:[#allocation2 + $0x1e4] ss:$16 sps:$4 sm:$0xff]  }
  0x37   :  { %1015 = vmatprep.subr.bf16.mxu1 %v2832_v20  ;;  %v2856_v36 = vld [vmem:[#allocation2 + $0x3e4] ss:$16 sps:$4 sm:$0xff]   ;;  %v2858_v37 = vld [vmem:[#allocation2 + $0x1e0] ss:$16 sps:$4 sm:$0xff]  }
  0x38   :  { %v2859_v38 = vld [vmem:[#allocation2 + $0x3e0] ss:$16 sps:$4 sm:$0xff]   ;;  %v2860_v39 = vld [vmem:[#allocation2 + $0x1c4] ss:$16 sps:$4 sm:$0xff]  }
  0x39   :  { %975 = vmatpush1.bf16.msra.mxu0 %v2834_v21  ;;  %v2862_v40 = vld [vmem:[#allocation2 + $0x3c4] ss:$16 sps:$4 sm:$0xff]   ;;  %v2864_v41 = vld [vmem:[#allocation2 + $0x1c0] ss:$16 sps:$4 sm:$0xff]  }
  0x3a   :  { %1016 = vmatpush1.bf16.msra.mxu1 %v2835_v22  ;;  %976 = vmatprep.subr.bf16.mxu0 %v2836_v23  ;;  %v2865_v42 = vld [vmem:[#allocation2 + $0x3c0] ss:$16 sps:$4 sm:$0xff]   ;;  %v2866_v43 = vld [vmem:[#allocation2 + $0x1a4] ss:$16 sps:$4 sm:$0xff]   ;;  %v151_v23 = vrot.slane %v142_v13, %v3385_v9 }
  0x3b   :  { %1017 = vmatprep.subr.bf16.mxu1 %v2838_v24  ;;  %v2868_v44 = vld [vmem:[#allocation2 + $0x3a4] ss:$16 sps:$4 sm:$0xff]   ;;  %v2870_v45 = vld [vmem:[#allocation2 + $0x1a0] ss:$16 sps:$4 sm:$0xff]   ;;  %v159_v24 = vrot.slane %v142_v13, %v3389_v11 }
  0x3c   :  { %v2871_v46 = vld [vmem:[#allocation2 + $0x3a0] ss:$16 sps:$4 sm:$0xff]   ;;  %v2872_v47 = vld [vmem:[#allocation2 + $0x184] ss:$16 sps:$4 sm:$0xff]  }
  0x3d   :  { %977 = vmatpush1.bf16.msra.mxu0 %v2840_v25  ;;  %v2874_v48 = vld [vmem:[#allocation2 + $0x384] ss:$16 sps:$4 sm:$0xff]   ;;  %v2876_v49 = vld [vmem:[#allocation2 + $0x180] ss:$16 sps:$4 sm:$0xff]   ;;  %v147_v25 = vrot.slane %v142_v13, %v3383_v8 }
  0x3e   :  { %1018 = vmatpush1.bf16.msra.mxu1 %v2841_v26  ;;  %978 = vmatprep.subr.bf16.mxu0 %v2842_v27  ;;  %v2877_v50 = vld [vmem:[#allocation2 + $0x380] ss:$16 sps:$4 sm:$0xff]   ;;  %v2878_v51 = vld [vmem:[#allocation2 + $0x164] ss:$16 sps:$4 sm:$0xff]   ;;  %v155_v26 = vrot.slane %v142_v13, %v3387_v10  ;;  %v2935_v13 = vld [vmem:[#allocation2 + $0x248] ss:$16 sps:$4 sm:$0xff]  }
  0x3f   :  { %1019 = vmatprep.subr.bf16.mxu1 %v2844_v28  ;;  %v2880_v52 = vld [vmem:[#allocation2 + $0x364] ss:$16 sps:$4 sm:$0xff]   ;;  %v2882_v53 = vld [vmem:[#allocation2 + $0x160] ss:$16 sps:$4 sm:$0xff]  }
  0x40   :  { %v2883_v54 = vld [vmem:[#allocation2 + $0x360] ss:$16 sps:$4 sm:$0xff]   ;;  %v2884_v55 = vld [vmem:[#allocation2 + $0x144] ss:$16 sps:$4 sm:$0xff]  }
  0x41   :  { %979 = vmatpush1.bf16.msra.mxu0 %v2846_v29  ;;  %v2886_v56 = vld [vmem:[#allocation2 + $0x344] ss:$16 sps:$4 sm:$0xff]   ;;  %v2888_v57 = vld [vmem:[#allocation2 + $0x140] ss:$16 sps:$4 sm:$0xff]  }
  0x42   :  { %1020 = vmatpush1.bf16.msra.mxu1 %v2847_v30  ;;  %980 = vmatprep.subr.bf16.mxu0 %v2848_v31  ;;  %v2889_v58 = vld [vmem:[#allocation2 + $0x340] ss:$16 sps:$4 sm:$0xff]   ;;  %v2890_v59 = vld [vmem:[#allocation2 + $0x124] ss:$16 sps:$4 sm:$0xff]  }
  0x43   :  { %1021 = vmatprep.subr.bf16.mxu1 %v2850_v32  ;;  %v2892_v60 = vld [vmem:[#allocation2 + $0x324] ss:$16 sps:$4 sm:$0xff]   ;;  %v2894_v61 = vld [vmem:[#allocation2 + $0x120] ss:$16 sps:$4 sm:$0xff]  }
  0x44   :  { %v2895_v62 = vld [vmem:[#allocation2 + $0x320] ss:$16 sps:$4 sm:$0xff]   ;;  %v2896_v63 = vld [vmem:[#allocation2 + $0x104] ss:$16 sps:$4 sm:$0xff]  }
  0x45   :  { %981 = vmatpush1.bf16.msra.mxu0 %v2852_v33  ;;  %v2898_v0 = vld [vmem:[#allocation2 + $0x304] ss:$16 sps:$4 sm:$0xff]   ;;  %v2900_v1 = vld [vmem:[#allocation2 + $0x100] ss:$16 sps:$4 sm:$0xff]  }
  0x46   :  { %1022 = vmatpush1.bf16.msra.mxu1 %v2853_v34  ;;  %982 = vmatprep.subr.bf16.mxu0 %v2854_v35  ;;  %v2901_v2 = vld [vmem:[#allocation2 + $0x300] ss:$16 sps:$4 sm:$0xff]   ;;  %v76_v7 = vld [vmem:[%s3452_s1] ss:$2 sm:$0xf] }
  0x47   :  { %1023 = vmatprep.subr.bf16.mxu1 %v2856_v36  ;;  %v2460_v12 = vld [vmem:[%s3452_s1 + $0x1] ss:$2 sm:$0xf]  ;;  %v86_v15 = vrot.slane %v76_v7, %v3383_v8  ;;  %v90_v16 = vrot.slane %v76_v7, %v3385_v9  ;;  %v94_v17 = vrot.slane %v76_v7, %v3387_v10  ;;  %v98_v18 = vrot.slane %v76_v7, %v3389_v11 }
  0x48   :  { %v117_v19 = vrot.slane %v2460_v12, %v3383_v8  ;;  %v121_v20 = vrot.slane %v2460_v12, %v3385_v9  ;;  %v125_v21 = vrot.slane %v2460_v12, %v3387_v10  ;;  %v129_v22 = vrot.slane %v2460_v12, %v3389_v11  ;;  %v2937_v7 = vld [vmem:[#allocation2 + $0x24c] ss:$16 sps:$4 sm:$0xff]   ;;  %v2932_v12 = vld [vmem:[#allocation2 + $0x48] ss:$16 sps:$4 sm:$0xff]  }
  0x49   :  { %983 = vmatpush2.bf16.msra.mxu0 %v2858_v37 }
  0x4a   :  { %1024 = vmatpush2.bf16.msra.mxu1 %v2859_v38  ;;  %984 = vmatprep.subr.bf16.mxu0 %v2860_v39 }
  0x4b   :  { %1025 = vmatprep.subr.bf16.mxu1 %v2862_v40 }
  0x4d   :  { %985 = vmatpush2.bf16.msra.mxu0 %v2864_v41 }
  0x4e   :  { %1026 = vmatpush2.bf16.msra.mxu1 %v2865_v42  ;;  %986 = vmatprep.subr.bf16.mxu0 %v2866_v43 }
  0x4f   :  { %1027 = vmatprep.subr.bf16.mxu1 %v2868_v44 }
  0x51   :  { %987 = vmatpush2.bf16.msra.mxu0 %v2870_v45 }
  0x52   :  { %1028 = vmatpush2.bf16.msra.mxu1 %v2871_v46  ;;  %988 = vmatprep.subr.bf16.mxu0 %v2872_v47  ;;  %v2902_v46 = vld [vmem:[#allocation2 + $0xe8] ss:$16 sps:$4 sm:$0xff]  }
  0x53   :  { %1029 = vmatprep.subr.bf16.mxu1 %v2874_v48  ;;  %v2905_v47 = vld [vmem:[#allocation2 + $0x2e8] ss:$16 sps:$4 sm:$0xff]  }
  0x55   :  { %989 = vmatpush2.bf16.msra.mxu0 %v2876_v49 }
  0x56   :  { %1030 = vmatpush2.bf16.msra.mxu1 %v2877_v50  ;;  %990 = vmatprep.subr.bf16.mxu0 %v2878_v51 }
  0x57   :  { %1031 = vmatprep.subr.bf16.mxu1 %v2880_v52 }
  0x59   :  { %991 = vmatpush2.bf16.msra.mxu0 %v2882_v53 }
  0x5a   :  { %1032 = vmatpush2.bf16.msra.mxu1 %v2883_v54  ;;  %992 = vmatprep.subr.bf16.mxu0 %v2884_v55  ;;  %v2910_v54 = vld [vmem:[#allocation2 + $0xcc] ss:$16 sps:$4 sm:$0xff]  }
  0x5b   :  { %1033 = vmatprep.subr.bf16.mxu1 %v2886_v56  ;;  %v2913_v55 = vld [vmem:[#allocation2 + $0x2cc] ss:$16 sps:$4 sm:$0xff]   ;;  %v2908_v56 = vld [vmem:[#allocation2 + $0xc8] ss:$16 sps:$4 sm:$0xff]  }
  0x5d   :  { %993 = vmatpush2.bf16.msra.mxu0 %v2888_v57  ;;  %v2911_v57 = vld [vmem:[#allocation2 + $0x2c8] ss:$16 sps:$4 sm:$0xff]  }
  0x5e   :  { %1034 = vmatpush2.bf16.msra.mxu1 %v2889_v58  ;;  %994 = vmatprep.subr.bf16.mxu0 %v2890_v59  ;;  %v2916_v58 = vld [vmem:[#allocation2 + $0xac] ss:$16 sps:$4 sm:$0xff]  }
  0x5f   :  { %1035 = vmatprep.subr.bf16.mxu1 %v2892_v60  ;;  %v2919_v59 = vld [vmem:[#allocation2 + $0x2ac] ss:$16 sps:$4 sm:$0xff]   ;;  %v2914_v60 = vld [vmem:[#allocation2 + $0xa8] ss:$16 sps:$4 sm:$0xff]  }
  0x61   :  { %995 = vmatpush2.bf16.msra.mxu0 %v2894_v61  ;;  %v2917_v61 = vld [vmem:[#allocation2 + $0x2a8] ss:$16 sps:$4 sm:$0xff]  }
  0x62   :  { %1036 = vmatpush2.bf16.msra.mxu1 %v2895_v62  ;;  %996 = vmatprep.subr.bf16.mxu0 %v2896_v63  ;;  %v2922_v62 = vld [vmem:[#allocation2 + $0x8c] ss:$16 sps:$4 sm:$0xff]  }
  0x63   :  { %1037 = vmatprep.subr.bf16.mxu1 %v2898_v0  ;;  %v2925_v63 = vld [vmem:[#allocation2 + $0x28c] ss:$16 sps:$4 sm:$0xff]   ;;  %v2920_v0 = vld [vmem:[#allocation2 + $0x88] ss:$16 sps:$4 sm:$0xff]  }
  0x65   :  { %997 = vmatpush2.bf16.msra.mxu0 %v2900_v1  ;;  %v2923_v1 = vld [vmem:[#allocation2 + $0x288] ss:$16 sps:$4 sm:$0xff]  }
  0x66   :  { %1038 = vmatpush2.bf16.msra.mxu1 %v2901_v2  ;;  %1048 = vmatprep.subr.bf16.mxu0 %v2904_v3  ;;  %v2928_v2 = vld [vmem:[#allocation2 + $0x6c] ss:$16 sps:$4 sm:$0xff]  }
  0x67   :  { %1089 = vmatprep.subr.bf16.mxu1 %v2907_v4  ;;  %v2931_v3 = vld [vmem:[#allocation2 + $0x26c] ss:$16 sps:$4 sm:$0xff]   ;;  %v2926_v4 = vld [vmem:[#allocation2 + $0x68] ss:$16 sps:$4 sm:$0xff]  }
  0xa3   :  { %v80_v14 = vpop.permute.xlu0 %79 }
  0xa4   :  { %v103_v27 = vmul.f32 %v86_v15, %v80_v14  ;;  %v104_v28 = vmul.f32 %v90_v16, %v80_v14  ;;  %v105_v29 = vmul.f32 %v94_v17, %v80_v14  ;;  %v106_v30 = vmul.f32 %v98_v18, %v80_v14  ;;  %v2940_v14 = vld [vmem:[#allocation2 + $0x2c] ss:$16 sps:$4 sm:$0xff]   ;;  %v2938_v16 = vld [vmem:[#allocation2 + $0x28] ss:$16 sps:$4 sm:$0xff]  }
  0xa5   :  { %v2943_v15 = vld [vmem:[#allocation2 + $0x22c] ss:$16 sps:$4 sm:$0xff]   ;;  %v2941_v17 = vld [vmem:[#allocation2 + $0x228] ss:$16 sps:$4 sm:$0xff]  }
  0xa6   :  { %v2946_v18 = vld [vmem:[#allocation2 + $0xc] ss:$16 sps:$4 sm:$0xff]  }
  0xa8   :  { %v111_v31 = vpop.permute.xlu0 %110 }
  0xa9   :  { %v134_v32 = vmul.f32 %v117_v19, %v111_v31  ;;  %v135_v33 = vmul.f32 %v121_v20, %v111_v31  ;;  %v136_v34 = vmul.f32 %v125_v21, %v111_v31  ;;  %v137_v35 = vmul.f32 %v129_v22, %v111_v31  ;;  %v2949_v19 = vld [vmem:[#allocation2 + $0x20c] ss:$16 sps:$4 sm:$0xff]   ;;  %v2944_v20 = vld [vmem:[#allocation2 + $0x8] ss:$16 sps:$4 sm:$0xff]  }
  0xaa   :  { %v2947_v21 = vld [vmem:[#allocation2 + $0x208] ss:$16 sps:$4 sm:$0xff]   ;;  %v2952_v22 = vld [vmem:[#allocation2 + $0x1ec] ss:$16 sps:$4 sm:$0xff]  }
  0xab   :  { %v138_v36 = vadd.f32 %v134_v32, %v103_v27  ;;  %v140_v37 = vadd.f32 %v136_v34, %v105_v29  ;;  %v139_v38 = vadd.f32 %v135_v33, %v104_v28  ;;  %v141_v39 = vadd.f32 %v137_v35, %v106_v30  ;;  %v2961_v27 = vld [vmem:[#allocation2 + $0x3cc] ss:$16 sps:$4 sm:$0xff]   ;;  %v2956_v28 = vld [vmem:[#allocation2 + $0x1c8] ss:$16 sps:$4 sm:$0xff]  }
  0xac   :  { %v2959_v29 = vld [vmem:[#allocation2 + $0x3c8] ss:$16 sps:$4 sm:$0xff]   ;;  %v2964_v30 = vld [vmem:[#allocation2 + $0x1ac] ss:$16 sps:$4 sm:$0xff]  }
  0xad   :  { %v165_v40 = vadd.f32 %v151_v23, %v139_v38  ;;  %v167_v41 = vadd.f32 %v159_v24, %v141_v39  ;;  %v164_v42 = vadd.f32 %v147_v25, %v138_v36  ;;  %v166_v43 = vadd.f32 %v155_v26, %v140_v37  ;;  %v2955_v23 = vld [vmem:[#allocation2 + $0x3ec] ss:$16 sps:$4 sm:$0xff]   ;;  %v2950_v24 = vld [vmem:[#allocation2 + $0x1e8] ss:$16 sps:$4 sm:$0xff]  }
  0xae   :  { %v2953_v25 = vld [vmem:[#allocation2 + $0x3e8] ss:$16 sps:$4 sm:$0xff]   ;;  %v2958_v26 = vld [vmem:[#allocation2 + $0x1cc] ss:$16 sps:$4 sm:$0xff]  }
  0xaf   :  { %v169_v44 = vmax.f32 %v165_v40, 0.0  ;;  %v171_v45 = vmax.f32 %v167_v41, 0.0  ;;  %v168_v48 = vmax.f32 %v164_v42, 0.0  ;;  %v170_v49 = vmax.f32 %v166_v43, 0.0  ;;  %v2967_v31 = vld [vmem:[#allocation2 + $0x3ac] ss:$16 sps:$4 sm:$0xff]  }
  0xb0   :  { %v2962_v32 = vld [vmem:[#allocation2 + $0x1a8] ss:$16 sps:$4 sm:$0xff]   ;;  %v2970_v34 = vld [vmem:[#allocation2 + $0x18c] ss:$16 sps:$4 sm:$0xff]  }
  0xb1   :  { %v173_v50 = vpack.c.bf16 %v169_v44, %v169_v44  ;;  %v175_v51 = vpack.c.bf16 %v171_v45, %v171_v45  ;;  %v3409_v52 = vpack.c.bf16 %v168_v48, %v168_v48  ;;  %v3411_v53 = vpack.c.bf16 %v170_v49, %v170_v49  ;;  %v2965_v33 = vld [vmem:[#allocation2 + $0x3a8] ss:$16 sps:$4 sm:$0xff]   ;;  %v2973_v35 = vld [vmem:[#allocation2 + $0x38c] ss:$16 sps:$4 sm:$0xff]  }
  0xb2   :  { %v2968_v36 = vld [vmem:[#allocation2 + $0x188] ss:$16 sps:$4 sm:$0xff]   ;;  %v2976_v38 = vld [vmem:[#allocation2 + $0x16c] ss:$16 sps:$4 sm:$0xff]  }
  0xb3   :  { %998 = vmatprep.mubr.bf16.mxu0 %v173_v50  ;;  %1039 = vmatprep.mubr.bf16.mxu1 %v175_v51  ;;  %v2971_v37 = vld [vmem:[#allocation2 + $0x388] ss:$16 sps:$4 sm:$0xff]   ;;  %v2979_v39 = vld [vmem:[#allocation2 + $0x36c] ss:$16 sps:$4 sm:$0xff]  }
  0xb4   :  { %999 = vmatmul.mubr.bf16.vlgmr.msra.gmra.mxu0 %v3409_v52  ;;  %1040 = vmatmul.mubr.bf16.vlgmr.msra.gmra.mxu1 %v3411_v53  ;;  %v2974_v40 = vld [vmem:[#allocation2 + $0x168] ss:$16 sps:$4 sm:$0xff]   ;;  %v2982_v42 = vld [vmem:[#allocation2 + $0x14c] ss:$16 sps:$4 sm:$0xff]  }
  0xb5   :  { %1049 = vmatpush1.bf16.msra.mxu0 %v2902_v46  ;;  %1090 = vmatpush1.bf16.msra.mxu1 %v2905_v47  ;;  %v2977_v41 = vld [vmem:[#allocation2 + $0x368] ss:$16 sps:$4 sm:$0xff]   ;;  %v2985_v43 = vld [vmem:[#allocation2 + $0x34c] ss:$16 sps:$4 sm:$0xff]  }
  0xb6   :  { %1080 = vmatprep.mubr.bf16.mxu0 %v173_v50  ;;  %1121 = vmatprep.mubr.bf16.mxu1 %v175_v51  ;;  %v2980_v44 = vld [vmem:[#allocation2 + $0x148] ss:$16 sps:$4 sm:$0xff]   ;;  %v2988_v46 = vld [vmem:[#allocation2 + $0x12c] ss:$16 sps:$4 sm:$0xff]  }
  0xb7   :  { %1050 = vmatprep.subr.bf16.mxu0 %v2910_v54  ;;  %1091 = vmatprep.subr.bf16.mxu1 %v2913_v55  ;;  %v2983_v45 = vld [vmem:[#allocation2 + $0x348] ss:$16 sps:$4 sm:$0xff]   ;;  %v2991_v47 = vld [vmem:[#allocation2 + $0x32c] ss:$16 sps:$4 sm:$0xff]  }
  0xb8   :  { %v2986_v48 = vld [vmem:[#allocation2 + $0x128] ss:$16 sps:$4 sm:$0xff]   ;;  %v2994_v50 = vld [vmem:[#allocation2 + $0x10c] ss:$16 sps:$4 sm:$0xff]  }
  0xb9   :  { %1051 = vmatpush1.bf16.msra.mxu0 %v2908_v56  ;;  %1092 = vmatpush1.bf16.msra.mxu1 %v2911_v57  ;;  %v2989_v49 = vld [vmem:[#allocation2 + $0x328] ss:$16 sps:$4 sm:$0xff]   ;;  %v2997_v51 = vld [vmem:[#allocation2 + $0x30c] ss:$16 sps:$4 sm:$0xff]   ;;  %v3000_v56 = vld [vmem:[#allocation5 + $0xe4] ss:$16 sps:$4 sm:$0xff]  }
  0xba   :  { %1052 = vmatprep.subr.bf16.mxu0 %v2916_v58  ;;  %1093 = vmatprep.subr.bf16.mxu1 %v2919_v59  ;;  %v2992_v54 = vld [vmem:[#allocation2 + $0x108] ss:$16 sps:$4 sm:$0xff]   ;;  %v2998_v57 = vld [vmem:[#allocation5 + $0xe0] ss:$16 sps:$4 sm:$0xff]   ;;  %v3003_v58 = vld [vmem:[#allocation5 + $0xc4] ss:$16 sps:$4 sm:$0xff]  }
  0xbb   :  { %v2995_v55 = vld [vmem:[#allocation2 + $0x308] ss:$16 sps:$4 sm:$0xff]   ;;  %v3001_v59 = vld [vmem:[#allocation5 + $0xc0] ss:$16 sps:$4 sm:$0xff]  }
  0xbd   :  { %1053 = vmatpush1.bf16.msra.mxu0 %v2914_v60  ;;  %1094 = vmatpush1.bf16.msra.mxu1 %v2917_v61  ;;  %v3006_v60 = vld [vmem:[#allocation5 + $0xa4] ss:$16 sps:$4 sm:$0xff]   ;;  %v3004_v61 = vld [vmem:[#allocation5 + $0xa0] ss:$16 sps:$4 sm:$0xff]  }
  0xbe   :  { %1054 = vmatprep.subr.bf16.mxu0 %v2922_v62  ;;  %1095 = vmatprep.subr.bf16.mxu1 %v2925_v63  ;;  %v3009_v62 = vld [vmem:[#allocation5 + $0x84] ss:$16 sps:$4 sm:$0xff]   ;;  %v3007_v63 = vld [vmem:[#allocation5 + $0x80] ss:$16 sps:$4 sm:$0xff]  }
  0xc1   :  { %1055 = vmatpush1.bf16.msra.mxu0 %v2920_v0  ;;  %1096 = vmatpush1.bf16.msra.mxu1 %v2923_v1  ;;  %v3046_v0 = vld [vmem:[#allocation5 + $0x2e0] ss:$16 sps:$4 sm:$0xff]   ;;  %v3048_v1 = vld [vmem:[#allocation5 + $0x2e4] ss:$16 sps:$4 sm:$0xff]  }
  0xc2   :  { %1056 = vmatprep.subr.bf16.mxu0 %v2928_v2  ;;  %1097 = vmatprep.subr.bf16.mxu1 %v2931_v3  ;;  %v3012_v2 = vld [vmem:[#allocation5 + $0x64] ss:$16 sps:$4 sm:$0xff]   ;;  %v3052_v3 = vld [vmem:[#allocation5 + $0x2c0] ss:$16 sps:$4 sm:$0xff]  }
  0xc5   :  { %1057 = vmatpush1.bf16.msra.mxu0 %v2926_v4  ;;  %1098 = vmatpush1.bf16.msra.mxu1 %v2929_v5  ;;  %v3015_v4 = vld [vmem:[#allocation5 + $0x44] ss:$16 sps:$4 sm:$0xff]   ;;  %v3013_v5 = vld [vmem:[#allocation5 + $0x40] ss:$16 sps:$4 sm:$0xff]  }
  0xc6   :  { %1058 = vmatprep.subr.bf16.mxu0 %v2934_v6  ;;  %1099 = vmatprep.subr.bf16.mxu1 %v2937_v7  ;;  %v3058_v6 = vld [vmem:[#allocation5 + $0x2a0] ss:$16 sps:$4 sm:$0xff]   ;;  %v3060_v7 = vld [vmem:[#allocation5 + $0x2a4] ss:$16 sps:$4 sm:$0xff]  }
  0xc9   :  { %1059 = vmatpush1.bf16.msra.mxu0 %v2932_v12  ;;  %1100 = vmatpush1.bf16.msra.mxu1 %v2935_v13  ;;  %v3018_v12 = vld [vmem:[#allocation5 + $0x24] ss:$16 sps:$4 sm:$0xff]   ;;  %v3016_v13 = vld [vmem:[#allocation5 + $0x20] ss:$16 sps:$4 sm:$0xff]  }
  0xca   :  { %1060 = vmatprep.subr.bf16.mxu0 %v2940_v14  ;;  %1101 = vmatprep.subr.bf16.mxu1 %v2943_v15  ;;  %v3064_v14 = vld [vmem:[#allocation5 + $0x280] ss:$16 sps:$4 sm:$0xff]   ;;  %v3066_v15 = vld [vmem:[#allocation5 + $0x284] ss:$16 sps:$4 sm:$0xff]  }
  0xcd   :  { %1061 = vmatpush1.bf16.msra.mxu0 %v2938_v16  ;;  %1102 = vmatpush1.bf16.msra.mxu1 %v2941_v17  ;;  %v3021_v16 = vld [vmem:[#allocation5 + $0x4] ss:$16 sps:$4 sm:$0xff]   ;;  %v3019_v17 = vld [vmem:[#allocation5] ss:$16 sps:$4 sm:$0xff]  }
  0xce   :  { %1062 = vmatprep.subr.bf16.mxu0 %v2946_v18  ;;  %1103 = vmatprep.subr.bf16.mxu1 %v2949_v19  ;;  %v3070_v18 = vld [vmem:[#allocation5 + $0x260] ss:$16 sps:$4 sm:$0xff]   ;;  %v3072_v19 = vld [vmem:[#allocation5 + $0x264] ss:$16 sps:$4 sm:$0xff]  }
  0xd1   :  { %1063 = vmatpush1.bf16.msra.mxu0 %v2944_v20  ;;  %1104 = vmatpush1.bf16.msra.mxu1 %v2947_v21  ;;  %v3024_v20 = vld [vmem:[#allocation5 + $0x1e4] ss:$16 sps:$4 sm:$0xff]   ;;  %v3022_v21 = vld [vmem:[#allocation5 + $0x1e0] ss:$16 sps:$4 sm:$0xff]  }
  0xd2   :  { %1064 = vmatprep.subr.bf16.mxu0 %v2952_v22  ;;  %1105 = vmatprep.subr.bf16.mxu1 %v2955_v23  ;;  %v3076_v22 = vld [vmem:[#allocation5 + $0x240] ss:$16 sps:$4 sm:$0xff]   ;;  %v3078_v23 = vld [vmem:[#allocation5 + $0x244] ss:$16 sps:$4 sm:$0xff]  }
  0xd5   :  { %1065 = vmatpush2.bf16.msra.mxu0 %v2950_v24  ;;  %1106 = vmatpush2.bf16.msra.mxu1 %v2953_v25  ;;  %v3027_v24 = vld [vmem:[#allocation5 + $0x1c4] ss:$16 sps:$4 sm:$0xff]   ;;  %v3025_v25 = vld [vmem:[#allocation5 + $0x1c0] ss:$16 sps:$4 sm:$0xff]  }
  0xd6   :  { %1066 = vmatprep.subr.bf16.mxu0 %v2958_v26  ;;  %1107 = vmatprep.subr.bf16.mxu1 %v2961_v27  ;;  %v3082_v26 = vld [vmem:[#allocation5 + $0x220] ss:$16 sps:$4 sm:$0xff]   ;;  %v3084_v27 = vld [vmem:[#allocation5 + $0x224] ss:$16 sps:$4 sm:$0xff]  }
  0xd9   :  { %1067 = vmatpush2.bf16.msra.mxu0 %v2956_v28  ;;  %1108 = vmatpush2.bf16.msra.mxu1 %v2959_v29  ;;  %v3030_v28 = vld [vmem:[#allocation5 + $0x1a4] ss:$16 sps:$4 sm:$0xff]   ;;  %v3028_v29 = vld [vmem:[#allocation5 + $0x1a0] ss:$16 sps:$4 sm:$0xff]  }
  0xda   :  { %1068 = vmatprep.subr.bf16.mxu0 %v2964_v30  ;;  %1109 = vmatprep.subr.bf16.mxu1 %v2967_v31  ;;  %v3088_v30 = vld [vmem:[#allocation5 + $0x200] ss:$16 sps:$4 sm:$0xff]   ;;  %v3090_v31 = vld [vmem:[#allocation5 + $0x204] ss:$16 sps:$4 sm:$0xff]  }
  0xdd   :  { %1069 = vmatpush2.bf16.msra.mxu0 %v2962_v32  ;;  %1110 = vmatpush2.bf16.msra.mxu1 %v2965_v33  ;;  %v3033_v32 = vld [vmem:[#allocation5 + $0x184] ss:$16 sps:$4 sm:$0xff]   ;;  %v3031_v33 = vld [vmem:[#allocation5 + $0x180] ss:$16 sps:$4 sm:$0xff]  }
  0xde   :  { %1070 = vmatprep.subr.bf16.mxu0 %v2970_v34  ;;  %1111 = vmatprep.subr.bf16.mxu1 %v2973_v35  ;;  %v3094_v34 = vld [vmem:[#allocation5 + $0x3e0] ss:$16 sps:$4 sm:$0xff]   ;;  %v3096_v35 = vld [vmem:[#allocation5 + $0x3e4] ss:$16 sps:$4 sm:$0xff]  }
  0xe1   :  { %1071 = vmatpush2.bf16.msra.mxu0 %v2968_v36  ;;  %1112 = vmatpush2.bf16.msra.mxu1 %v2971_v37  ;;  %v3036_v36 = vld [vmem:[#allocation5 + $0x164] ss:$16 sps:$4 sm:$0xff]   ;;  %v3034_v37 = vld [vmem:[#allocation5 + $0x160] ss:$16 sps:$4 sm:$0xff]  }
  0xe2   :  { %1072 = vmatprep.subr.bf16.mxu0 %v2976_v38  ;;  %1113 = vmatprep.subr.bf16.mxu1 %v2979_v39  ;;  %v3100_v38 = vld [vmem:[#allocation5 + $0x3c0] ss:$16 sps:$4 sm:$0xff]   ;;  %v3102_v39 = vld [vmem:[#allocation5 + $0x3c4] ss:$16 sps:$4 sm:$0xff]  }
  0xe5   :  { %1073 = vmatpush2.bf16.msra.mxu0 %v2974_v40  ;;  %1114 = vmatpush2.bf16.msra.mxu1 %v2977_v41  ;;  %v3039_v40 = vld [vmem:[#allocation5 + $0x144] ss:$16 sps:$4 sm:$0xff]   ;;  %v3037_v41 = vld [vmem:[#allocation5 + $0x140] ss:$16 sps:$4 sm:$0xff]  }
  0xe6   :  { %1074 = vmatprep.subr.bf16.mxu0 %v2982_v42  ;;  %1115 = vmatprep.subr.bf16.mxu1 %v2985_v43  ;;  %v3106_v42 = vld [vmem:[#allocation5 + $0x3a0] ss:$16 sps:$4 sm:$0xff]   ;;  %v3108_v43 = vld [vmem:[#allocation5 + $0x3a4] ss:$16 sps:$4 sm:$0xff]  }
  0xe9   :  { %1075 = vmatpush2.bf16.msra.mxu0 %v2980_v44  ;;  %1116 = vmatpush2.bf16.msra.mxu1 %v2983_v45  ;;  %v3042_v44 = vld [vmem:[#allocation5 + $0x124] ss:$16 sps:$4 sm:$0xff]   ;;  %v3040_v45 = vld [vmem:[#allocation5 + $0x120] ss:$16 sps:$4 sm:$0xff]  }
  0xea   :  { %1076 = vmatprep.subr.bf16.mxu0 %v2988_v46  ;;  %1117 = vmatprep.subr.bf16.mxu1 %v2991_v47  ;;  %v3112_v46 = vld [vmem:[#allocation5 + $0x380] ss:$16 sps:$4 sm:$0xff]   ;;  %v3114_v47 = vld [vmem:[#allocation5 + $0x384] ss:$16 sps:$4 sm:$0xff]  }
  0xed   :  { %1077 = vmatpush2.bf16.msra.mxu0 %v2986_v48  ;;  %1118 = vmatpush2.bf16.msra.mxu1 %v2989_v49  ;;  %v3045_v48 = vld [vmem:[#allocation5 + $0x104] ss:$16 sps:$4 sm:$0xff]   ;;  %v3043_v49 = vld [vmem:[#allocation5 + $0x100] ss:$16 sps:$4 sm:$0xff]  }
  0xee   :  { %1078 = vmatprep.subr.bf16.mxu0 %v2994_v50  ;;  %1119 = vmatprep.subr.bf16.mxu1 %v2997_v51  ;;  %v3118_v50 = vld [vmem:[#allocation5 + $0x360] ss:$16 sps:$4 sm:$0xff]   ;;  %v3120_v51 = vld [vmem:[#allocation5 + $0x364] ss:$16 sps:$4 sm:$0xff]  }
  0xf1   :  { %1079 = vmatpush2.bf16.msra.mxu0 %v2992_v54  ;;  %1120 = vmatpush2.bf16.msra.mxu1 %v2995_v55  ;;  %v3051_v54 = vld [vmem:[#allocation5 + $0xec] ss:$16 sps:$4 sm:$0xff]   ;;  %v3124_v55 = vld [vmem:[#allocation5 + $0x340] ss:$16 sps:$4 sm:$0xff]  }
  0xf2   :  { %1928 = vmatprep.subr.bf16.mxu0 %v3000_v56  ;;  %1969 = vmatprep.subr.bf16.mxu1 %v3048_v1  ;;  %v3126_v56 = vld [vmem:[#allocation5 + $0x344] ss:$16 sps:$4 sm:$0xff]  }
  0xf4   :  { %1081 = vmatmul.mubr.bf16.vlgmr.msra.gmra.mxu0 %v3409_v52  ;;  %1122 = vmatmul.mubr.bf16.vlgmr.msra.gmra.mxu1 %v3411_v53  ;;  %v3010_v52 = vld [vmem:[#allocation5 + $0x60] ss:$16 sps:$4 sm:$0xff]   ;;  %v3054_v53 = vld [vmem:[#allocation5 + $0x2c4] ss:$16 sps:$4 sm:$0xff]  }
  0xf5   :  { %1929 = vmatpush1.bf16.msra.mxu0 %v2998_v57  ;;  %1970 = vmatpush1.bf16.msra.mxu1 %v3046_v0  ;;  %v3132_v57 = vld [vmem:[#allocation5 + $0x324] ss:$16 sps:$4 sm:$0xff]  }
  0xf6   :  { %1930 = vmatprep.subr.bf16.mxu0 %v3003_v58  ;;  %1971 = vmatprep.subr.bf16.mxu1 %v3054_v53  ;;  %v3130_v58 = vld [vmem:[#allocation5 + $0x320] ss:$16 sps:$4 sm:$0xff]  }
  0xf9   :  { %1931 = vmatpush1.bf16.msra.mxu0 %v3001_v59  ;;  %1972 = vmatpush1.bf16.msra.mxu1 %v3052_v3  ;;  %v3138_v59 = vld [vmem:[#allocation5 + $0x304] ss:$16 sps:$4 sm:$0xff]  }
  0xfa   :  { %1932 = vmatprep.subr.bf16.mxu0 %v3006_v60  ;;  %1973 = vmatprep.subr.bf16.mxu1 %v3060_v7  ;;  %v3136_v60 = vld [vmem:[#allocation5 + $0x300] ss:$16 sps:$4 sm:$0xff]  }
  0xfd   :  { %1933 = vmatpush1.bf16.msra.mxu0 %v3004_v61  ;;  %1974 = vmatpush1.bf16.msra.mxu1 %v3058_v6  ;;  %v3144_v61 = vld [vmem:[#allocation5 + $0x2ec] ss:$16 sps:$4 sm:$0xff]  }
  0xfe   :  { %1934 = vmatprep.subr.bf16.mxu0 %v3009_v62  ;;  %1975 = vmatprep.subr.bf16.mxu1 %v3066_v15  ;;  %v3420_v62 = vld [vmem:[%s3455_s4] sm:$0xf] }
  0xff   :  { %v313_v0 = vrot.slane %v3420_v62, %v3385_v9 }
 0x101   :  { %1935 = vmatpush1.bf16.msra.mxu0 %v3007_v63  ;;  %1976 = vmatpush1.bf16.msra.mxu1 %v3064_v14  ;;  %v309_v63 = vrot.slane %v3420_v62, %v3383_v8 }
 0x102   :  { %1936 = vmatprep.subr.bf16.mxu0 %v3012_v2  ;;  %1977 = vmatprep.subr.bf16.mxu1 %v3072_v19 }
 0x105   :  { %1937 = vmatpush1.bf16.msra.mxu0 %v3010_v52  ;;  %1978 = vmatpush1.bf16.msra.mxu1 %v3070_v18  ;;  %v3049_v18 = vld [vmem:[#allocation5 + $0xe8] ss:$16 sps:$4 sm:$0xff]  }
 0x106   :  { %1938 = vmatprep.subr.bf16.mxu0 %v3015_v4  ;;  %1979 = vmatprep.subr.bf16.mxu1 %v3078_v23  ;;  %v3061_v23 = vld [vmem:[#allocation5 + $0xa8] ss:$16 sps:$4 sm:$0xff]  }
 0x109   :  { %1939 = vmatpush1.bf16.msra.mxu0 %v3013_v5  ;;  %1980 = vmatpush1.bf16.msra.mxu1 %v3076_v22  ;;  %v3063_v22 = vld [vmem:[#allocation5 + $0xac] ss:$16 sps:$4 sm:$0xff]  }
 0x10a   :  { %1940 = vmatprep.subr.bf16.mxu0 %v3018_v12  ;;  %1981 = vmatprep.subr.bf16.mxu1 %v3084_v27  ;;  %v3073_v27 = vld [vmem:[#allocation5 + $0x68] ss:$16 sps:$4 sm:$0xff]  }
 0x10d   :  { %1941 = vmatpush1.bf16.msra.mxu0 %v3016_v13  ;;  %1982 = vmatpush1.bf16.msra.mxu1 %v3082_v26  ;;  %v3075_v26 = vld [vmem:[#allocation5 + $0x6c] ss:$16 sps:$4 sm:$0xff]  }
 0x10e   :  { %1942 = vmatprep.subr.bf16.mxu0 %v3021_v16  ;;  %1983 = vmatprep.subr.bf16.mxu1 %v3090_v31  ;;  %v3085_v31 = vld [vmem:[#allocation5 + $0x28] ss:$16 sps:$4 sm:$0xff]  }
 0x111   :  { %1943 = vmatpush1.bf16.msra.mxu0 %v3019_v17  ;;  %1984 = vmatpush1.bf16.msra.mxu1 %v3088_v30  ;;  %v3087_v30 = vld [vmem:[#allocation5 + $0x2c] ss:$16 sps:$4 sm:$0xff]  }
 0x112   :  { %1944 = vmatprep.subr.bf16.mxu0 %v3024_v20  ;;  %1985 = vmatprep.subr.bf16.mxu1 %v3096_v35  ;;  %v3057_v20 = vld [vmem:[#allocation5 + $0xcc] ss:$16 sps:$4 sm:$0xff]   ;;  %v3097_v35 = vld [vmem:[#allocation5 + $0x1e8] ss:$16 sps:$4 sm:$0xff]  }
 0x115   :  { %1945 = vmatpush2.bf16.msra.mxu0 %v3022_v21  ;;  %1986 = vmatpush2.bf16.msra.mxu1 %v3094_v34  ;;  %v3055_v21 = vld [vmem:[#allocation5 + $0xc8] ss:$16 sps:$4 sm:$0xff]   ;;  %v3099_v34 = vld [vmem:[#allocation5 + $0x1ec] ss:$16 sps:$4 sm:$0xff]  }
 0x116   :  { %1946 = vmatprep.subr.bf16.mxu0 %v3027_v24  ;;  %1987 = vmatprep.subr.bf16.mxu1 %v3102_v39  ;;  %v3069_v24 = vld [vmem:[#allocation5 + $0x8c] ss:$16 sps:$4 sm:$0xff]   ;;  %v3109_v39 = vld [vmem:[#allocation5 + $0x1a8] ss:$16 sps:$4 sm:$0xff]  }
 0x119   :  { %1947 = vmatpush2.bf16.msra.mxu0 %v3025_v25  ;;  %1988 = vmatpush2.bf16.msra.mxu1 %v3100_v38  ;;  %v3067_v25 = vld [vmem:[#allocation5 + $0x88] ss:$16 sps:$4 sm:$0xff]   ;;  %v3111_v38 = vld [vmem:[#allocation5 + $0x1ac] ss:$16 sps:$4 sm:$0xff]  }
 0x11a   :  { %1948 = vmatprep.subr.bf16.mxu0 %v3030_v28  ;;  %1989 = vmatprep.subr.bf16.mxu1 %v3108_v43  ;;  %v3081_v28 = vld [vmem:[#allocation5 + $0x4c] ss:$16 sps:$4 sm:$0xff]   ;;  %v3121_v43 = vld [vmem:[#allocation5 + $0x168] ss:$16 sps:$4 sm:$0xff]  }
 0x11d   :  { %1949 = vmatpush2.bf16.msra.mxu0 %v3028_v29  ;;  %1990 = vmatpush2.bf16.msra.mxu1 %v3106_v42  ;;  %v3079_v29 = vld [vmem:[#allocation5 + $0x48] ss:$16 sps:$4 sm:$0xff]   ;;  %v3123_v42 = vld [vmem:[#allocation5 + $0x16c] ss:$16 sps:$4 sm:$0xff]  }
 0x11e   :  { %1950 = vmatprep.subr.bf16.mxu0 %v3033_v32  ;;  %1991 = vmatprep.subr.bf16.mxu1 %v3114_v47  ;;  %v3093_v32 = vld [vmem:[#allocation5 + $0xc] ss:$16 sps:$4 sm:$0xff]  }
 0x11f   :  { %v3135_v47 = vld [vmem:[#allocation5 + $0x12c] ss:$16 sps:$4 sm:$0xff]  }
 0x121   :  { %1951 = vmatpush2.bf16.msra.mxu0 %v3031_v33  ;;  %1992 = vmatpush2.bf16.msra.mxu1 %v3112_v46  ;;  %v3091_v33 = vld [vmem:[#allocation5 + $0x8] ss:$16 sps:$4 sm:$0xff]  }
 0x122   :  { %1952 = vmatprep.subr.bf16.mxu0 %v3036_v36  ;;  %1993 = vmatprep.subr.bf16.mxu1 %v3120_v51  ;;  %v3105_v36 = vld [vmem:[#allocation5 + $0x1cc] ss:$16 sps:$4 sm:$0xff]   ;;  %v3127_v46 = vld [vmem:[#allocation5 + $0x148] ss:$16 sps:$4 sm:$0xff]  }
 0x125   :  { %1953 = vmatpush2.bf16.msra.mxu0 %v3034_v37  ;;  %1994 = vmatpush2.bf16.msra.mxu1 %v3118_v50  ;;  %v3103_v37 = vld [vmem:[#allocation5 + $0x1c8] ss:$16 sps:$4 sm:$0xff]  }
 0x126   :  { %1954 = vmatprep.subr.bf16.mxu0 %v3039_v40  ;;  %1995 = vmatprep.subr.bf16.mxu1 %v3126_v56  ;;  %v3117_v40 = vld [vmem:[#allocation5 + $0x18c] ss:$16 sps:$4 sm:$0xff]  }
 0x129   :  { %1955 = vmatpush2.bf16.msra.mxu0 %v3037_v41  ;;  %1996 = vmatpush2.bf16.msra.mxu1 %v3124_v55  ;;  %v3115_v41 = vld [vmem:[#allocation5 + $0x188] ss:$16 sps:$4 sm:$0xff]  }
 0x12a   :  { %1956 = vmatprep.subr.bf16.mxu0 %v3042_v44  ;;  %1997 = vmatprep.subr.bf16.mxu1 %v3132_v57  ;;  %v3129_v44 = vld [vmem:[#allocation5 + $0x14c] ss:$16 sps:$4 sm:$0xff]  }
 0x12b   :  { %v3141_v57 = vld [vmem:[#allocation5 + $0x10c] ss:$16 sps:$4 sm:$0xff]  }
 0x12d   :  { %1957 = vmatpush2.bf16.msra.mxu0 %v3040_v45  ;;  %1998 = vmatpush2.bf16.msra.mxu1 %v3130_v58  ;;  %v317_v45 = vrot.slane %v3420_v62, %v3387_v10 }
 0x12e   :  { %1958 = vmatprep.subr.bf16.mxu0 %v3045_v48  ;;  %1999 = vmatprep.subr.bf16.mxu1 %v3138_v59  ;;  %v321_v48 = vrot.slane %v3420_v62, %v3389_v11 }
 0x131   :  { %1959 = vmatpush2.bf16.msra.mxu0 %v3043_v49  ;;  %2000 = vmatpush2.bf16.msra.mxu1 %v3136_v60 }
 0x132   :  { %2010 = vmatprep.subr.bf16.mxu0 %v3051_v54  ;;  %2051 = vmatprep.subr.bf16.mxu1 %v3144_v61  ;;  %v3133_v54 = vld [vmem:[#allocation5 + $0x128] ss:$16 sps:$4 sm:$0xff]  }
 0x174   :  { %v1000_v1 = vpop.f32.mrf.mxu0  ;;  %v1041_v2 = vpop.f32.mrf.mxu1 }
 0x175   :  { %v1001_v52 = vadd.f32 %v1000_v1, %v309_v63 }
 0x176   :  { %v1002_v3 = vpop.f32.mrf.mxu0  ;;  %v1043_v53 = vpop.f32.mrf.mxu1 }
 0x177   :  { %v1042_v4 = vadd.f32 %v1041_v2, %v1001_v52  ;;  %v1003_v5 = vadd.f32 %v1002_v3, %v313_v0  ;;  %v3139_v0 = vld [vmem:[#allocation5 + $0x108] ss:$16 sps:$4 sm:$0xff]  }
 0x178   :  { %v1004_v6 = vpop.f32.mrf.mxu0  ;;  %v1045_v7 = vpop.f32.mrf.mxu1 }
 0x179   :  { %v1044_v12 = vadd.f32 %v1043_v53, %v1003_v5  ;;  %v1130_v13 = vmax.f32 %v1042_v4, 0.0  ;;  %v3142_v53 = vld [vmem:[#allocation5 + $0x2e8] ss:$16 sps:$4 sm:$0xff]   ;;  %v3147_v5 = vld [vmem:[#allocation5 + $0x2cc] ss:$16 sps:$4 sm:$0xff]  }
 0x17a   :  { %v1005_v14 = vpop.f32.mrf.mxu0  ;;  %v1046_v15 = vpop.f32.mrf.mxu1  ;;  %v3145_v6 = vld [vmem:[#allocation5 + $0x2c8] ss:$16 sps:$4 sm:$0xff]   ;;  %v3150_v7 = vld [vmem:[#allocation5 + $0x2ac] ss:$16 sps:$4 sm:$0xff]  }
 0x17b   :  { %v1131_v16 = vmax.f32 %v1044_v12, 0.0  ;;  %v3426_v19 = vpack.c.bf16 %v1130_v13, %v1130_v13  ;;  %v3148_v12 = vld [vmem:[#allocation5 + $0x2a8] ss:$16 sps:$4 sm:$0xff]   ;;  %v3153_v13 = vld [vmem:[#allocation5 + $0x28c] ss:$16 sps:$4 sm:$0xff]  }
 0x17c   :  { %v3190_v14 = vld [vmem:[#allocation7 + $0x78] sm:$0xff]  }
 0x17d   :  { %v1135_v17 = vpack.c.bf16 %v1131_v16, %v1131_v16  ;;  %v3191_v15 = vld [vmem:[#allocation7 + $0x38] sm:$0xff]   ;;  %v3192_v16 = vld [vmem:[#allocation7 + $0x70] sm:$0xff]  }
 0x17f   :  { %1960 = vmatprep.mubr.bf16.mxu0 %v1135_v17 }
 0x180   :  { %1961 = vmatmul.mubr.bf16.vlgmr.msra.gmra.mxu0 %v3426_v19 }
 0x181   :  { %2011 = vmatpush1.bf16.msra.mxu0 %v3049_v18  ;;  %2042 = vmatprep.mubr.bf16.mxu0 %v1135_v17  ;;  %v3151_v17 = vld [vmem:[#allocation5 + $0x288] ss:$16 sps:$4 sm:$0xff]   ;;  %v3193_v18 = vld [vmem:[#allocation7 + $0x30] sm:$0xff]  }
 0x182   :  { %2012 = vmatprep.subr.bf16.mxu0 %v3057_v20  ;;  %v3156_v20 = vld [vmem:[#allocation5 + $0x26c] ss:$16 sps:$4 sm:$0xff]  }
 0x185   :  { %2013 = vmatpush1.bf16.msra.mxu0 %v3055_v21  ;;  %v3154_v21 = vld [vmem:[#allocation5 + $0x268] ss:$16 sps:$4 sm:$0xff]  }
 0x186   :  { %2014 = vmatprep.subr.bf16.mxu0 %v3063_v22  ;;  %v3195_v22 = vld [vmem:[#allocation7 + $0x28] sm:$0xff]  }
 0x189   :  { %2015 = vmatpush1.bf16.msra.mxu0 %v3061_v23  ;;  %v3159_v23 = vld [vmem:[#allocation5 + $0x24c] ss:$16 sps:$4 sm:$0xff]  }
 0x18a   :  { %2016 = vmatprep.subr.bf16.mxu0 %v3069_v24  ;;  %v3196_v24 = vld [vmem:[#allocation7 + $0x60] sm:$0xff]  }
 0x18d   :  { %2017 = vmatpush1.bf16.msra.mxu0 %v3067_v25  ;;  %v3157_v25 = vld [vmem:[#allocation5 + $0x248] ss:$16 sps:$4 sm:$0xff]  }
 0x18e   :  { %2018 = vmatprep.subr.bf16.mxu0 %v3075_v26  ;;  %v3197_v26 = vld [vmem:[#allocation7 + $0x20] sm:$0xff]  }
 0x191   :  { %2019 = vmatpush1.bf16.msra.mxu0 %v3073_v27  ;;  %v3162_v27 = vld [vmem:[#allocation5 + $0x22c] ss:$16 sps:$4 sm:$0xff]  }
 0x192   :  { %2020 = vmatprep.subr.bf16.mxu0 %v3081_v28  ;;  %v3198_v28 = vld [vmem:[#allocation7 + $0x58] sm:$0xff]  }
 0x195   :  { %2021 = vmatpush1.bf16.msra.mxu0 %v3079_v29  ;;  %v3160_v29 = vld [vmem:[#allocation5 + $0x228] ss:$16 sps:$4 sm:$0xff]  }
 0x196   :  { %2022 = vmatprep.subr.bf16.mxu0 %v3087_v30  ;;  %v3199_v30 = vld [vmem:[#allocation7 + $0x18] sm:$0xff]  }
 0x199   :  { %2023 = vmatpush1.bf16.msra.mxu0 %v3085_v31  ;;  %v3165_v31 = vld [vmem:[#allocation5 + $0x20c] ss:$16 sps:$4 sm:$0xff]  }
 0x19a   :  { %2024 = vmatprep.subr.bf16.mxu0 %v3093_v32  ;;  %v3200_v32 = vld [vmem:[#allocation7 + $0x50] sm:$0xff]  }
 0x19d   :  { %2025 = vmatpush1.bf16.msra.mxu0 %v3091_v33  ;;  %v3163_v33 = vld [vmem:[#allocation5 + $0x208] ss:$16 sps:$4 sm:$0xff]  }
 0x19e   :  { %2026 = vmatprep.subr.bf16.mxu0 %v3099_v34  ;;  %v3201_v34 = vld [vmem:[#allocation7 + $0x10] sm:$0xff]  }
 0x1a1   :  { %2027 = vmatpush2.bf16.msra.mxu0 %v3097_v35  ;;  %v3168_v35 = vld [vmem:[#allocation5 + $0x3ec] ss:$16 sps:$4 sm:$0xff]  }
 0x1a2   :  { %2028 = vmatprep.subr.bf16.mxu0 %v3105_v36  ;;  %v3166_v36 = vld [vmem:[#allocation5 + $0x3e8] ss:$16 sps:$4 sm:$0xff]  }
 0x1a5   :  { %2029 = vmatpush2.bf16.msra.mxu0 %v3103_v37  ;;  %v3171_v37 = vld [vmem:[#allocation5 + $0x3cc] ss:$16 sps:$4 sm:$0xff]  }
 0x1a6   :  { %2030 = vmatprep.subr.bf16.mxu0 %v3111_v38  ;;  %v3169_v38 = vld [vmem:[#allocation5 + $0x3c8] ss:$16 sps:$4 sm:$0xff]  }
 0x1a9   :  { %2031 = vmatpush2.bf16.msra.mxu0 %v3109_v39  ;;  %v3174_v39 = vld [vmem:[#allocation5 + $0x3ac] ss:$16 sps:$4 sm:$0xff]  }
 0x1aa   :  { %2032 = vmatprep.subr.bf16.mxu0 %v3117_v40  ;;  %v3172_v40 = vld [vmem:[#allocation5 + $0x3a8] ss:$16 sps:$4 sm:$0xff]  }
 0x1ad   :  { %2033 = vmatpush2.bf16.msra.mxu0 %v3115_v41  ;;  %v3177_v41 = vld [vmem:[#allocation5 + $0x38c] ss:$16 sps:$4 sm:$0xff]  }
 0x1ae   :  { %2034 = vmatprep.subr.bf16.mxu0 %v3123_v42  ;;  %v3175_v42 = vld [vmem:[#allocation5 + $0x388] ss:$16 sps:$4 sm:$0xff]  }
 0x1b1   :  { %2035 = vmatpush2.bf16.msra.mxu0 %v3121_v43  ;;  %v3180_v43 = vld [vmem:[#allocation5 + $0x36c] ss:$16 sps:$4 sm:$0xff]  }
 0x1b2   :  { %2036 = vmatprep.subr.bf16.mxu0 %v3129_v44  ;;  %v3178_v44 = vld [vmem:[#allocation5 + $0x368] ss:$16 sps:$4 sm:$0xff]  }
 0x1b4   :  { %v1082_v49 = vpop.f32.mrf.mxu0  ;;  %v1123_v50 = vpop.f32.mrf.mxu1 }
 0x1b5   :  { %v1083_v51 = vadd.f32 %v1082_v49, %v317_v45  ;;  %2037 = vmatpush2.bf16.msra.mxu0 %v3127_v46  ;;  %v3183_v45 = vld [vmem:[#allocation5 + $0x34c] ss:$16 sps:$4 sm:$0xff]   ;;  %v3181_v46 = vld [vmem:[#allocation5 + $0x348] ss:$16 sps:$4 sm:$0xff]  }
 0x1b6   :  { %v1084_v55 = vpop.f32.mrf.mxu0  ;;  %v1125_v56 = vpop.f32.mrf.mxu1  ;;  %2038 = vmatprep.subr.bf16.mxu0 %v3135_v47  ;;  %v3186_v47 = vld [vmem:[#allocation5 + $0x32c] ss:$16 sps:$4 sm:$0xff]  }
 0x1b7   :  { %v1124_v58 = vadd.f32 %v1123_v50, %v1083_v51  ;;  %v1085_v59 = vadd.f32 %v1084_v55, %v321_v48  ;;  %v3184_v48 = vld [vmem:[#allocation5 + $0x328] ss:$16 sps:$4 sm:$0xff]   ;;  %v3189_v49 = vld [vmem:[#allocation5 + $0x30c] ss:$16 sps:$4 sm:$0xff]   ;;  %v3204_v55 = vld [vmem:[#allocation7 + $0x40] sm:$0xff]  }
 0x1b8   :  { %v1086_v60 = vpop.f32.mrf.mxu0  ;;  %v1127_v61 = vpop.f32.mrf.mxu1  ;;  %v3187_v50 = vld [vmem:[#allocation5 + $0x308] ss:$16 sps:$4 sm:$0xff]  }
 0x1b9   :  { %v1126_v63 = vadd.f32 %v1125_v56, %v1085_v59  ;;  %2039 = vmatpush2.bf16.msra.mxu0 %v3133_v54  ;;  %v1132_v1 = vmax.f32 %v1124_v58, 0.0  ;;  %v3202_v51 = vld [vmem:[#allocation7 + $0x48] sm:$0xff]   ;;  %v3205_v56 = vld [vmem:[#allocation7] sm:$0xff]   ;;  %v3207_v58 = vld [vmem:[#allocation7 + $0xb8] sm:$0xff]  }
 0x1ba   :  { %v1087_v2 = vpop.f32.mrf.mxu0  ;;  %v1128_v52 = vpop.f32.mrf.mxu1  ;;  %2040 = vmatprep.subr.bf16.mxu0 %v3141_v57  ;;  %v3203_v54 = vld [vmem:[#allocation7 + $0x8] sm:$0xff]   ;;  %v3206_v57 = vld [vmem:[#allocation7 + $0xf8] sm:$0xff]   ;;  %v3208_v59 = vld [vmem:[#allocation7 + $0xf0] sm:$0xff]  }
 0x1bb   :  { %v1133_v62 = vmax.f32 %v1126_v63, 0.0  ;;  %v3433_v4 = vpack.c.bf16 %v1132_v1, %v1132_v1  ;;  %v3209_v60 = vld [vmem:[#allocation7 + $0xb0] sm:$0xff]   ;;  %v3210_v61 = vld [vmem:[#allocation7 + $0xe8] sm:$0xff]   ;;  %v3213_v1 = vld [vmem:[#allocation7 + $0xa0] sm:$0xff]  }
 0x1bc   :  { %v3211_v63 = vld [vmem:[#allocation7 + $0xa8] sm:$0xff]   ;;  %v3214_v2 = vld [vmem:[#allocation7 + $0xd8] sm:$0xff]  }
 0x1bd   :  { %v1137_v3 = vpack.c.bf16 %v1133_v62, %v1133_v62  ;;  %2041 = vmatpush2.bf16.msra.mxu0 %v3139_v0  ;;  %v3212_v0 = vld [vmem:[#allocation7 + $0xe0] sm:$0xff]   ;;  %v3215_v52 = vld [vmem:[#allocation7 + $0x98] sm:$0xff]   ;;  %v3216_v62 = vld [vmem:[#allocation7 + $0xd0] sm:$0xff]  }
 0x1be   :  { %2750 = vmatprep.subr.bf16.mxu0 %v3190_v14 }
 0x1bf   :  { %2001 = vmatprep.mubr.bf16.mxu1 %v1137_v3 }
 0x1c0   :  { %2002 = vmatmul.mubr.bf16.vlgmr.msra.gmra.mxu1 %v3433_v4  ;;  %2043 = vmatmul.mubr.bf16.vlgmr.msra.gmra.mxu0 %v3426_v19  ;;  %v3194_v19 = vld [vmem:[#allocation7 + $0x68] sm:$0xff]  }
 0x1c1   :  { %2052 = vmatpush1.bf16.msra.mxu1 %v3142_v53  ;;  %2083 = vmatprep.mubr.bf16.mxu1 %v1137_v3  ;;  %v3217_v3 = vld [vmem:[#allocation7 + $0x90] sm:$0xff]  }
 0x1c2   :  { %2053 = vmatprep.subr.bf16.mxu1 %v3147_v5  ;;  %2751 = vmatpush3.bf16.msra.mxu0 %v3191_v15  ;;  %v3219_v5 = vld [vmem:[#allocation7 + $0x88] sm:$0xff]   ;;  %v1266_v15 = vld [vmem:[%s3457_s6] sm:$0xf] }
 0x1c3   :  { %2752 = vmatprep.subr.bf16.mxu0 %v3192_v16  ;;  %v1271_v16 = vrot.slane %v1266_v15, %v3383_v8  ;;  %v1279_v8 = vrot.slane %v1266_v15, %v3387_v10 }
 0x1c5   :  { %2054 = vmatpush1.bf16.msra.mxu1 %v3145_v6 }
 0x1c6   :  { %2055 = vmatprep.subr.bf16.mxu1 %v3150_v7  ;;  %2753 = vmatpush3.bf16.msra.mxu0 %v3193_v18 }
 0x1c7   :  { %2754 = vmatprep.subr.bf16.mxu0 %v3194_v19 }
 0x1c9   :  { %2056 = vmatpush1.bf16.msra.mxu1 %v3148_v12  ;;  %v3220_v12 = vld [vmem:[#allocation7 + $0xc0] sm:$0xff]  }
 0x1ca   :  { %2057 = vmatprep.subr.bf16.mxu1 %v3153_v13  ;;  %2755 = vmatpush3.bf16.msra.mxu0 %v3195_v22  ;;  %v3221_v13 = vld [vmem:[#allocation7 + $0x80] sm:$0xff]  }
 0x1cb   :  { %2756 = vmatprep.subr.bf16.mxu0 %v3196_v24 }
 0x1cd   :  { %2058 = vmatpush1.bf16.msra.mxu1 %v3151_v17  ;;  %v1275_v17 = vrot.slane %v1266_v15, %v3385_v9  ;;  %v1283_v9 = vrot.slane %v1266_v15, %v3389_v11  ;;  %v2717_v11 = vld [vmem:[%s3459_s8] ss:$0 sm:$0xff] }
 0x1ce   :  { %2059 = vmatprep.subr.bf16.mxu1 %v3156_v20  ;;  %2757 = vmatpush3.bf16.msra.mxu0 %v3197_v26 }
 0x1cf   :  { %2758 = vmatprep.subr.bf16.mxu0 %v3198_v28 }
 0x1d1   :  { %2060 = vmatpush1.bf16.msra.mxu1 %v3154_v21 }
 0x1d2   :  { %2061 = vmatprep.subr.bf16.mxu1 %v3159_v23  ;;  %2759 = vmatpush3.bf16.msra.mxu0 %v3199_v30 }
 0x1d3   :  { %2760 = vmatprep.subr.bf16.mxu0 %v3200_v32 }
 0x1d5   :  { %2062 = vmatpush1.bf16.msra.mxu1 %v3157_v25 }
 0x1d6   :  { %2063 = vmatprep.subr.bf16.mxu1 %v3162_v27  ;;  %2761 = vmatpush3.bf16.msra.mxu0 %v3201_v34 }
 0x1d7   :  { %2762 = vmatprep.subr.bf16.mxu0 %v3202_v51 }
 0x1d9   :  { %2064 = vmatpush1.bf16.msra.mxu1 %v3160_v29 }
 0x1da   :  { %2065 = vmatprep.subr.bf16.mxu1 %v3165_v31  ;;  %2763 = vmatpush3.bf16.msra.mxu0 %v3203_v54 }
 0x1db   :  { %2764 = vmatprep.subr.bf16.mxu0 %v3204_v55 }
 0x1dd   :  { %2066 = vmatpush1.bf16.msra.mxu1 %v3163_v33 }
 0x1de   :  { %2067 = vmatprep.subr.bf16.mxu1 %v3168_v35  ;;  %2765 = vmatpush3.bf16.msra.mxu0 %v3205_v56 }
 0x1e1   :  { %2068 = vmatpush2.bf16.msra.mxu1 %v3166_v36 }
 0x1e2   :  { %2069 = vmatprep.subr.bf16.mxu1 %v3171_v37 }
 0x1e5   :  { %2070 = vmatpush2.bf16.msra.mxu1 %v3169_v38 }
 0x1e6   :  { %2071 = vmatprep.subr.bf16.mxu1 %v3174_v39 }
 0x1e9   :  { %2072 = vmatpush2.bf16.msra.mxu1 %v3172_v40 }
 0x1ea   :  { %2073 = vmatprep.subr.bf16.mxu1 %v3177_v41 }
 0x1ed   :  { %2074 = vmatpush2.bf16.msra.mxu1 %v3175_v42 }
 0x1ee   :  { %2075 = vmatprep.subr.bf16.mxu1 %v3180_v43 }
 0x1f1   :  { %2076 = vmatpush2.bf16.msra.mxu1 %v3178_v44 }
 0x1f2   :  { %2077 = vmatprep.subr.bf16.mxu1 %v3183_v45 }
 0x1f5   :  { %2078 = vmatpush2.bf16.msra.mxu1 %v3181_v46 }
 0x1f6   :  { %2079 = vmatprep.subr.bf16.mxu1 %v3186_v47 }
 0x1f9   :  { %2080 = vmatpush2.bf16.msra.mxu1 %v3184_v48 }
 0x1fa   :  { %2081 = vmatprep.subr.bf16.mxu1 %v3189_v49 }
 0x1fd   :  { %2082 = vmatpush2.bf16.msra.mxu1 %v3187_v50 }
 0x1fe   :  { %2772 = vmatprep.subr.bf16.mxu1 %v3206_v57 }
 0x200   :  { %2084 = vmatmul.mubr.bf16.vlgmr.msra.gmra.mxu1 %v3433_v4  ;;  %v3218_v4 = vld [vmem:[#allocation7 + $0xc8] sm:$0xff]  }
 0x201   :  { %2773 = vmatpush3.bf16.msra.mxu1 %v3207_v58 }
 0x202   :  { %2774 = vmatprep.subr.bf16.mxu1 %v3208_v59 }
 0x205   :  { %2775 = vmatpush3.bf16.msra.mxu1 %v3209_v60 }
 0x206   :  { %2776 = vmatprep.subr.bf16.mxu1 %v3210_v61 }
 0x209   :  { %2777 = vmatpush3.bf16.msra.mxu1 %v3211_v63 }
 0x20a   :  { %2778 = vmatprep.subr.bf16.mxu1 %v3212_v0 }
 0x20d   :  { %2779 = vmatpush3.bf16.msra.mxu1 %v3213_v1 }
 0x20e   :  { %2780 = vmatprep.subr.bf16.mxu1 %v3214_v2 }
 0x211   :  { %2781 = vmatpush3.bf16.msra.mxu1 %v3215_v52 }
 0x212   :  { %2782 = vmatprep.subr.bf16.mxu1 %v3216_v62 }
 0x215   :  { %2783 = vmatpush3.bf16.msra.mxu1 %v3217_v3 }
 0x216   :  { %2784 = vmatprep.subr.bf16.mxu1 %v3218_v4 }
 0x219   :  { %2785 = vmatpush3.bf16.msra.mxu1 %v3219_v5 }
 0x21a   :  { %2786 = vmatprep.subr.bf16.mxu1 %v3220_v12 }
 0x21d   :  { %2787 = vmatpush3.bf16.msra.mxu1 %v3221_v13 }
 0x240   :  { %v1962_v53 = vpop.f32.mrf.mxu0 }
 0x241   :  { %v1963_v18 = vadd.f32 %v1962_v53, %v1271_v16 }
 0x242   :  { %v1964_v6 = vpop.f32.mrf.mxu0 }
 0x243   :  { %v1965_v21 = vadd.f32 %v1964_v6, %v1275_v17 }
 0x244   :  { %v1966_v7 = vpop.f32.mrf.mxu0 }
 0x246   :  { %v1967_v14 = vpop.f32.mrf.mxu0 }
 0x280   :  { %v2003_v20 = vpop.f32.mrf.mxu1  ;;  %v2044_v19 = vpop.f32.mrf.mxu0 }
 0x281   :  { %v2004_v22 = vadd.f32 %v2003_v20, %v1963_v18  ;;  %v2045_v34 = vadd.f32 %v2044_v19, %v1279_v8 }
 0x282   :  { %v2005_v23 = vpop.f32.mrf.mxu1  ;;  %v2046_v24 = vpop.f32.mrf.mxu0 }
 0x283   :  { %v2006_v25 = vadd.f32 %v2005_v23, %v1965_v21  ;;  %v2092_v26 = vmax.f32 %v2004_v22, 0.0  ;;  %v2047_v36 = vadd.f32 %v2046_v24, %v1283_v9 }
 0x284   :  { %v2007_v27 = vpop.f32.mrf.mxu1  ;;  %v2048_v28 = vpop.f32.mrf.mxu0 }
 0x285   :  { %v2093_v29 = vmax.f32 %v2006_v25, 0.0  ;;  %v2096_v33 = vpack.c.bf16 %v2092_v26, %v2092_v26 }
 0x286   :  { %v2008_v30 = vpop.f32.mrf.mxu1  ;;  %v2049_v31 = vpop.f32.mrf.mxu0 }
 0x287   :  { %v2097_v32 = vpack.c.bf16 %v2093_v29, %v2093_v29 }
 0x289   :  { %2395 = vmatprep.mubr.bf16.mxu0 %v2097_v32 }
 0x28a   :  { %2396 = vmatmul.mubr.bf16.vlgmr.msra.gmra.mxu0 %v2096_v33 }
 0x2c0   :  { %v2085_v35 = vpop.f32.mrf.mxu1 }
 0x2c1   :  { %v2086_v37 = vadd.f32 %v2085_v35, %v2045_v34 }
 0x2c2   :  { %v2087_v38 = vpop.f32.mrf.mxu1 }
 0x2c3   :  { %v2088_v39 = vadd.f32 %v2087_v38, %v2047_v36  ;;  %v2094_v40 = vmax.f32 %v2086_v37, 0.0 }
 0x2c4   :  { %v2089_v41 = vpop.f32.mrf.mxu1 }
 0x2c5   :  { %v2095_v42 = vmax.f32 %v2088_v39, 0.0  ;;  %v2098_v45 = vpack.c.bf16 %v2094_v40, %v2094_v40 }
 0x2c6   :  { %v2090_v43 = vpop.f32.mrf.mxu1 }
 0x2c7   :  { %v2099_v44 = vpack.c.bf16 %v2095_v42, %v2095_v42 }
 0x2c9   :  { %2435 = vmatprep.mubr.bf16.mxu1 %v2099_v44 }
 0x2ca   :  { %2436 = vmatmul.mubr.bf16.vlgmr.msra.gmra.mxu1 %v2098_v45 }
 0x34a   :  { %v2766_v46 = vpop.f32.mrf.mxu0 }
 0x34c   :  { %v2767_v47 = vpop.f32.mrf.mxu0 }
 0x34d   :  { %v2768_v49 = vadd.f32 %v2767_v47, %v2766_v46 }
 0x34e   :  { %v2769_v48 = vpop.f32.mrf.mxu0 }
 0x34f   :  { %v2398_v54 = vadd.f32 %v2768_v49, %v2717_v11 }
 0x350   :  { %v2770_v10 = vpop.f32.mrf.mxu0 }
 0x38a   :  { %v2788_v50 = vpop.f32.mrf.mxu1 }
 0x38c   :  { %v2789_v51 = vpop.f32.mrf.mxu1 }
 0x38d   :  { %v2790_v55 = vadd.f32 %v2789_v51, %v2788_v50 }
 0x38e   :  { %v2791_v56 = vpop.f32.mrf.mxu1 }
 0x38f   :  { %v2438_v57 = vadd.f32 %v2790_v55, %v2398_v54 }
 0x390   :  { %v2792_v58 = vpop.f32.mrf.mxu1 }
 0x391   :  { %2443 = vst [vmem:[#allocation8] sm:$0xff] %v2438_v57 }
 0x392   :  { %3293 = shalt.err (!%p3290_p5)
}
 0x393   :  { %2453 = dma.vmem_to_hbm [thread:$0]  %s2451_s14, 128, %s3460_s9, [#allocation4]  }
 0x394   :  { %3306 = dma.done.wait [#allocation4], 128  }
 0x395   :  { %3307 = vsyncadd [#allocation4], 4294967168 }
 0x396   :  { %2457 = vsyncpa [#allocation3], 1 }
 0x397   :  { %2458 = vsyncpa [#allocation6], 1 }
 0x398   :  { %2459 = vsyncpa [#allocation4], 1 }

</bundles_post_ra>
